<compile_context>
chip_gen: v7x
topology: tpu7x:2x2x1
jax: 0.10.0
libtpu: 0.0.40
codegen_flags: <defaults>
</compile_context>

<pallas_src>
import functools
import math

import jax
import jax.numpy as jnp
from jax.experimental import pallas as pl
from jax.experimental.pallas import tpu as pltpu


def _dwconv_kernel(x_ref, w_ref, o_ref, *scratch, stride, padding,
                   h_out, w_out, c_in_pg, c_out_pg, c_out, kh, kw, bb):
    # x_ref: (bb, C_in, H, W)           input block (VMEM)
    # w_ref: (taps, C_out, 1, W_out)    per-tap weight rows, pre-broadcast (VMEM)
    # o_ref: (bb, C_out, H_out, W_out)  output block (VMEM)
    # scratch[0] (only if padding>0): (C_in, Hp, Wp) zero-padded input scratch
    c_in = x_ref.shape[1]
    h_in = x_ref.shape[2]
    w_in = x_ref.shape[3]
    hp = h_in + 2 * padding
    wp = w_in + 2 * padding
    xpad_ref = scratch[0] if scratch else None

    # Zero only the halo (boundary strips) once per grid step: the interior is
    # fully overwritten for every batch element and the halo stays zero.
    if padding > 0:
        xpad_ref[:, :padding, :] = jnp.zeros((c_in, padding, wp), jnp.float32)
        xpad_ref[:, hp - padding:, :] = jnp.zeros((c_in, padding, wp), jnp.float32)
        xpad_ref[:, :, :padding] = jnp.zeros((c_in, hp, padding), jnp.float32)
        xpad_ref[:, :, wp - padding:] = jnp.zeros((c_in, hp, padding), jnp.float32)

    for b in range(bb):  # static unroll; bb is 1 or N (small)
        if padding > 0:
            xpad_ref[:, padding:padding + h_in, padding:padding + w_in] = x_ref[b]
            x_pad = xpad_ref[...]                        # (C_in, Hp, Wp)
            # TODO(synk): consider building the padded block as an in-register
            # value (jnp.pad/concat) to skip the VMEM store+reload; verify the
            # lowering doesn't just re-materialize a copy.
        else:
            x_pad = x_ref[b]                             # (C_in, H, W)

        acc = jnp.zeros((c_out, h_out, w_out), jnp.float32)
        for ci in range(c_in_pg):
            if c_in_pg == 1 and c_out_pg == 1:
                # Pure depthwise: output channel co reads input channel co.
                xg = x_pad
            else:
                # General grouped case: gather input channels into
                # output-channel order (static indices, tiny stack).
                # TODO(synk): for c_in_pg >= ~8-16 switch to im2col + MXU
                # jnp.dot(preferred_element_type=f32) instead of VPU taps.
                idx = [(co // c_out_pg) * c_in_pg + ci for co in range(c_out)]
                xg = jnp.stack([x_pad[k] for k in idx])  # (C_out, Hp, Wp)
            for i in range(kh):
                for j in range(kw):
                    wt = w_ref[(ci * kh + i) * kw + j]   # (C_out, 1, W_out)
                    if stride == 1:
                        patch = xg[:, i:i + h_out, j:j + w_out]
                    else:
                        # TODO(synk): stride>1 path (lane-strided slice per tap)
                        # is untested here; for real strided configs compute
                        # the dense stride-1 product and subsample once.
                        patch = xg[:, i:i + (h_out - 1) * stride + 1:stride,
                                      j:j + (w_out - 1) * stride + 1:stride]
                    acc = acc + wt * patch
        # Single whole-block store for this batch element.
        o_ref[b] = acc.astype(o_ref.dtype)
        # TODO(synk): if real workloads keep W small, repack C_out*W (or batch)
        # into lanes for >12.5% VPU lane utilization; irrelevant at demo size.


def dwconv(x, weight, *, stride, padding):
    """Grouped conv2d matching nn.Conv2d(..., groups=gcd(C_in, C_out), bias=False).

    x:      (N, C_in, H, W)            float32, NCHW
    weight: (C_out, C_in//groups, KH, KW)
    """
    n, c_in, h, w = x.shape
    c_out, c_in_pg, kh, kw = weight.shape
    assert c_in % c_in_pg == 0
    groups = c_in // c_in_pg
    assert c_out % groups == 0
    c_out_pg = c_out // groups

    hp, wp = h + 2 * padding, w + 2 * padding
    h_out = (hp - kh) // stride + 1
    w_out = (wp - kw) // stride + 1
    taps = c_in_pg * kh * kw

    # Per-tap weight rows, pre-broadcast over the lane (W) dim wrapper-side
    # (tiny tensor): the kernel does no scalar loads / per-channel splats.
    w_planes = jnp.broadcast_to(
        weight.astype(jnp.float32).transpose(1, 2, 3, 0).reshape(taps, c_out, 1, 1),
        (taps, c_out, 1, w_out))

    # Size-gated grid: collapse to a single step when per-step work cannot
    # hide per-grid-step overhead (~0.35us) / v7x cross-core split; otherwise
    # one batch element per "parallel" step so both v7x TensorCores get work.
    per_elem_macs = c_out * c_in_pg * kh * kw * h_out * w_out
    bb = n if per_elem_macs < (1 << 17) else 1
    grid = (n // bb,)  # bb is 1 or n, divides exactly

    kernel = functools.partial(
        _dwconv_kernel, stride=stride, padding=padding, h_out=h_out,
        w_out=w_out, c_in_pg=c_in_pg, c_out_pg=c_out_pg, c_out=c_out,
        kh=kh, kw=kw, bb=bb)

    scratch_shapes = []
    if padding > 0:
        scratch_shapes.append(pltpu.VMEM((c_in, hp, wp), jnp.float32))
    # TODO(synk): when scaling, tile C_in so c_in*hp*wp*4B (+ double-buffered
    # in/out blocks) stays within the v7x budget (~16-24 MiB) and set
    # vmem_limit_bytes explicitly in CompilerParams.

    return pl.pallas_call(
        kernel,
        out_shape=jax.ShapeDtypeStruct((n, c_out, h_out, w_out), x.dtype),
        grid_spec=pltpu.PrefetchScalarGridSpec(
            num_scalar_prefetch=0,
            grid=grid,
            in_specs=[
                pl.BlockSpec((bb, c_in, h, w), lambda b: (b, 0, 0, 0)),
                pl.BlockSpec((taps, c_out, 1, w_out), lambda b: (0, 0, 0, 0)),
            ],
            out_specs=pl.BlockSpec((bb, c_out, h_out, w_out),
                                   lambda b: (b, 0, 0, 0)),
            scratch_shapes=tuple(scratch_shapes),
        ),
        compiler_params=pltpu.CompilerParams(
            dimension_semantics=("parallel",) if bb == 1 else ("arbitrary",)),
    )(x, w_planes)


if __name__ == "__main__":
    key = jax.random.PRNGKey(0)
    kx, kw_key = jax.random.split(key)

    def make_weight(k, c_in, c_out, ksz):
        groups = math.gcd(c_in, c_out)
        fan_in = (c_in // groups) * ksz * ksz
        bound = 1.0 / math.sqrt(fan_in)
        wgt = jax.random.uniform(
            k, (c_out, c_in // groups, ksz, ksz),
            minval=-bound, maxval=bound, dtype=jnp.float32)
        return wgt, groups

    def ref_conv(xv, wv, stride, padding, groups):
        return jax.lax.conv_general_dilated(
            xv, wv, window_strides=(stride, stride),
            padding=[(padding, padding), (padding, padding)],
            dimension_numbers=("NCHW", "OIHW", "NCHW"),
            feature_group_count=groups)

    # Module config: DWConv(in_channels=4, out_channels=4, kernel_size=3,
    #                       stride=1, padding=1, bias=False)
    x = jax.random.normal(kx, (2, 4, 16, 16), dtype=jnp.float32)
    weight, groups = make_weight(kw_key, 4, 4, 3)

    out = jax.block_until_ready(dwconv(x, weight, stride=1, padding=1))
    ref = ref_conv(x, weight, 1, 1, groups)
    assert out.shape == ref.shape
    assert jnp.allclose(out, ref, rtol=1e-4, atol=1e-4)

    # padding=0 path (previously untested, per review).
    out0 = jax.block_until_ready(dwconv(x, weight, stride=1, padding=0))
    ref0 = ref_conv(x, weight, 1, 0, groups)
    assert out0.shape == ref0.shape
    assert jnp.allclose(out0, ref0, rtol=1e-4, atol=1e-4)

    print("KERNEL_OK")
</pallas_src>

<mosaic_0001>
module attributes {stable_mosaic.version = 11 : i64} {
  func.func @_dwconv_kernel(%arg0: i32, %arg1: memref<2x4x16x16xf32, #tpu.memory_space<vmem>>, %arg2: memref<9x4x1x16xf32, #tpu.memory_space<vmem>>, %arg3: memref<2x4x16x16xf32, #tpu.memory_space<vmem>>, %arg4: memref<4x18x18xf32, #tpu.memory_space<vmem>>) attributes {dimension_semantics = [#tpu.dimension_semantics<arbitrary>], iteration_bounds = array<i64: 1>, scalar_prefetch = 0 : i64, scratch_operands = 1 : i64, tpu.core_type = #tpu.core_type<tc>, window_params = [{transform_indices = @transform_0, window_bounds = array<i64: 2, 4, 16, 16>}, {pipeline_mode = #tpu.pipeline_mode<synchronous>, transform_indices = @transform_1, window_bounds = array<i64: 9, 4, 1, 16>}, {transform_indices = @transform_2, window_bounds = array<i64: 2, 4, 16, 16>}]} {
    %cst = arith.constant 0.000000e+00 : f32
    %0 = vector.broadcast %cst : f32 to vector<4x1x18xf32>
    %c0 = arith.constant 0 : index
    %c0_0 = arith.constant 0 : index
    %c0_1 = arith.constant 0 : index
    %1 = vector.load %arg4[%c0, %c0_0, %c0_1] : memref<4x18x18xf32, #tpu.memory_space<vmem>>, vector<4x1x18xf32>
    tpu.vector_store %arg4[%c0, %c0_0, %c0_1], %0 {strides = array<i32>} : memref<4x18x18xf32, #tpu.memory_space<vmem>>, vector<4x1x18xf32>,
    %cst_2 = arith.constant 0.000000e+00 : f32
    %2 = vector.broadcast %cst_2 : f32 to vector<4x1x18xf32>
    %c0_3 = arith.constant 0 : index
    %c17 = arith.constant 17 : index
    %c0_4 = arith.constant 0 : index
    %3 = vector.load %arg4[%c0_3, %c17, %c0_4] : memref<4x18x18xf32, #tpu.memory_space<vmem>>, vector<4x1x18xf32>
    tpu.vector_store %arg4[%c0_3, %c17, %c0_4], %2 {strides = array<i32>} : memref<4x18x18xf32, #tpu.memory_space<vmem>>, vector<4x1x18xf32>,
    %cst_5 = arith.constant 0.000000e+00 : f32
    %4 = vector.broadcast %cst_5 : f32 to vector<4x18x1xf32>
    %c0_6 = arith.constant 0 : index
    %c0_7 = arith.constant 0 : index
    %c0_8 = arith.constant 0 : index
    %5 = vector.load %arg4[%c0_6, %c0_7, %c0_8] : memref<4x18x18xf32, #tpu.memory_space<vmem>>, vector<4x18x1xf32>
    tpu.vector_store %arg4[%c0_6, %c0_7, %c0_8], %4 {strides = array<i32>} : memref<4x18x18xf32, #tpu.memory_space<vmem>>, vector<4x18x1xf32>,
    %cst_9 = arith.constant 0.000000e+00 : f32
    %6 = vector.broadcast %cst_9 : f32 to vector<4x18x1xf32>
    %c0_10 = arith.constant 0 : index
    %c0_11 = arith.constant 0 : index
    %c17_12 = arith.constant 17 : index
    %7 = vector.load %arg4[%c0_10, %c0_11, %c17_12] : memref<4x18x18xf32, #tpu.memory_space<vmem>>, vector<4x18x1xf32>
    tpu.vector_store %arg4[%c0_10, %c0_11, %c17_12], %6 {strides = array<i32>} : memref<4x18x18xf32, #tpu.memory_space<vmem>>, vector<4x18x1xf32>,
    %c0_13 = arith.constant 0 : index
    %c0_14 = arith.constant 0 : index
    %c0_15 = arith.constant 0 : index
    %c0_16 = arith.constant 0 : index
    %8 = vector.load %arg1[%c0_13, %c0_14, %c0_15, %c0_16] : memref<2x4x16x16xf32, #tpu.memory_space<vmem>>, vector<1x4x16x16xf32>
    %9 = vector.shape_cast %8 : vector<1x4x16x16xf32> to vector<4x16x16xf32>
    %c0_17 = arith.constant 0 : index
    %c1 = arith.constant 1 : index
    %c1_18 = arith.constant 1 : index
    %10 = vector.load %arg4[%c0_17, %c1, %c1_18] : memref<4x18x18xf32, #tpu.memory_space<vmem>>, vector<4x16x16xf32>
    tpu.vector_store %arg4[%c0_17, %c1, %c1_18], %9 {strides = array<i32>} : memref<4x18x18xf32, #tpu.memory_space<vmem>>, vector<4x16x16xf32>,
    %c0_19 = arith.constant 0 : index
    %c0_20 = arith.constant 0 : index
    %c0_21 = arith.constant 0 : index
    %11 = vector.load %arg4[%c0_19, %c0_20, %c0_21] : memref<4x18x18xf32, #tpu.memory_space<vmem>>, vector<4x18x18xf32>
    %cst_22 = arith.constant 0.000000e+00 : f32
    %12 = vector.broadcast %cst_22 : f32 to vector<4x16x16xf32>
    %c0_23 = arith.constant 0 : index
    %c0_24 = arith.constant 0 : index
    %c0_25 = arith.constant 0 : index
    %c0_26 = arith.constant 0 : index
    %13 = vector.load %arg2[%c0_23, %c0_24, %c0_25, %c0_26] : memref<9x4x1x16xf32, #tpu.memory_space<vmem>>, vector<1x4x1x16xf32>
    %14 = vector.shape_cast %13 : vector<1x4x1x16xf32> to vector<4x1x16xf32>
    %15 = vector.extract_strided_slice %11 {offsets = [0, 0, 0], sizes = [4, 16, 16], strides = [1, 1, 1]} : vector<4x18x18xf32> to vector<4x16x16xf32>
    %16 = vector.broadcast %14 : vector<4x1x16xf32> to vector<4x16x16xf32>
    %17 = arith.mulf %16, %15 : vector<4x16x16xf32>
    %18 = arith.addf %12, %17 : vector<4x16x16xf32>
    %c1_27 = arith.constant 1 : index
    %c0_28 = arith.constant 0 : index
    %c0_29 = arith.constant 0 : index
    %c0_30 = arith.constant 0 : index
    %19 = vector.load %arg2[%c1_27, %c0_28, %c0_29, %c0_30] : memref<9x4x1x16xf32, #tpu.memory_space<vmem>>, vector<1x4x1x16xf32>
    %20 = vector.shape_cast %19 : vector<1x4x1x16xf32> to vector<4x1x16xf32>
    %21 = vector.extract_strided_slice %11 {offsets = [0, 0, 1], sizes = [4, 16, 16], strides = [1, 1, 1]} : vector<4x18x18xf32> to vector<4x16x16xf32>
    %22 = vector.broadcast %20 : vector<4x1x16xf32> to vector<4x16x16xf32>
    %23 = arith.mulf %22, %21 : vector<4x16x16xf32>
    %24 = arith.addf %18, %23 : vector<4x16x16xf32>
    %c2 = arith.constant 2 : index
    %c0_31 = arith.constant 0 : index
    %c0_32 = arith.constant 0 : index
    %c0_33 = arith.constant 0 : index
    %25 = vector.load %arg2[%c2, %c0_31, %c0_32, %c0_33] : memref<9x4x1x16xf32, #tpu.memory_space<vmem>>, vector<1x4x1x16xf32>
    %26 = vector.shape_cast %25 : vector<1x4x1x16xf32> to vector<4x1x16xf32>
    %27 = vector.extract_strided_slice %11 {offsets = [0, 0, 2], sizes = [4, 16, 16], strides = [1, 1, 1]} : vector<4x18x18xf32> to vector<4x16x16xf32>
    %28 = vector.broadcast %26 : vector<4x1x16xf32> to vector<4x16x16xf32>
    %29 = arith.mulf %28, %27 : vector<4x16x16xf32>
    %30 = arith.addf %24, %29 : vector<4x16x16xf32>
    %c3 = arith.constant 3 : index
    %c0_34 = arith.constant 0 : index
    %c0_35 = arith.constant 0 : index
    %c0_36 = arith.constant 0 : index
    %31 = vector.load %arg2[%c3, %c0_34, %c0_35, %c0_36] : memref<9x4x1x16xf32, #tpu.memory_space<vmem>>, vector<1x4x1x16xf32>
    %32 = vector.shape_cast %31 : vector<1x4x1x16xf32> to vector<4x1x16xf32>
    %33 = vector.extract_strided_slice %11 {offsets = [0, 1, 0], sizes = [4, 16, 16], strides = [1, 1, 1]} : vector<4x18x18xf32> to vector<4x16x16xf32>
    %34 = vector.broadcast %32 : vector<4x1x16xf32> to vector<4x16x16xf32>
    %35 = arith.mulf %34, %33 : vector<4x16x16xf32>
    %36 = arith.addf %30, %35 : vector<4x16x16xf32>
    %c4 = arith.constant 4 : index
    %c0_37 = arith.constant 0 : index
    %c0_38 = arith.constant 0 : index
    %c0_39 = arith.constant 0 : index
    %37 = vector.load %arg2[%c4, %c0_37, %c0_38, %c0_39] : memref<9x4x1x16xf32, #tpu.memory_space<vmem>>, vector<1x4x1x16xf32>
    %38 = vector.shape_cast %37 : vector<1x4x1x16xf32> to vector<4x1x16xf32>
    %39 = vector.extract_strided_slice %11 {offsets = [0, 1, 1], sizes = [4, 16, 16], strides = [1, 1, 1]} : vector<4x18x18xf32> to vector<4x16x16xf32>
    %40 = vector.broadcast %38 : vector<4x1x16xf32> to vector<4x16x16xf32>
    %41 = arith.mulf %40, %39 : vector<4x16x16xf32>
    %42 = arith.addf %36, %41 : vector<4x16x16xf32>
    %c5 = arith.constant 5 : index
    %c0_40 = arith.constant 0 : index
    %c0_41 = arith.constant 0 : index
    %c0_42 = arith.constant 0 : index
    %43 = vector.load %arg2[%c5, %c0_40, %c0_41, %c0_42] : memref<9x4x1x16xf32, #tpu.memory_space<vmem>>, vector<1x4x1x16xf32>
    %44 = vector.shape_cast %43 : vector<1x4x1x16xf32> to vector<4x1x16xf32>
    %45 = vector.extract_strided_slice %11 {offsets = [0, 1, 2], sizes = [4, 16, 16], strides = [1, 1, 1]} : vector<4x18x18xf32> to vector<4x16x16xf32>
    %46 = vector.broadcast %44 : vector<4x1x16xf32> to vector<4x16x16xf32>
    %47 = arith.mulf %46, %45 : vector<4x16x16xf32>
    %48 = arith.addf %42, %47 : vector<4x16x16xf32>
    %c6 = arith.constant 6 : index
    %c0_43 = arith.constant 0 : index
    %c0_44 = arith.constant 0 : index
    %c0_45 = arith.constant 0 : index
    %49 = vector.load %arg2[%c6, %c0_43, %c0_44, %c0_45] : memref<9x4x1x16xf32, #tpu.memory_space<vmem>>, vector<1x4x1x16xf32>
    %50 = vector.shape_cast %49 : vector<1x4x1x16xf32> to vector<4x1x16xf32>
    %51 = vector.extract_strided_slice %11 {offsets = [0, 2, 0], sizes = [4, 16, 16], strides = [1, 1, 1]} : vector<4x18x18xf32> to vector<4x16x16xf32>
    %52 = vector.broadcast %50 : vector<4x1x16xf32> to vector<4x16x16xf32>
    %53 = arith.mulf %52, %51 : vector<4x16x16xf32>
    %54 = arith.addf %48, %53 : vector<4x16x16xf32>
    %c7 = arith.constant 7 : index
    %c0_46 = arith.constant 0 : index
    %c0_47 = arith.constant 0 : index
    %c0_48 = arith.constant 0 : index
    %55 = vector.load %arg2[%c7, %c0_46, %c0_47, %c0_48] : memref<9x4x1x16xf32, #tpu.memory_space<vmem>>, vector<1x4x1x16xf32>
    %56 = vector.shape_cast %55 : vector<1x4x1x16xf32> to vector<4x1x16xf32>
    %57 = vector.extract_strided_slice %11 {offsets = [0, 2, 1], sizes = [4, 16, 16], strides = [1, 1, 1]} : vector<4x18x18xf32> to vector<4x16x16xf32>
    %58 = vector.broadcast %56 : vector<4x1x16xf32> to vector<4x16x16xf32>
    %59 = arith.mulf %58, %57 : vector<4x16x16xf32>
    %60 = arith.addf %54, %59 : vector<4x16x16xf32>
    %c8 = arith.constant 8 : index
    %c0_49 = arith.constant 0 : index
    %c0_50 = arith.constant 0 : index
    %c0_51 = arith.constant 0 : index
    %61 = vector.load %arg2[%c8, %c0_49, %c0_50, %c0_51] : memref<9x4x1x16xf32, #tpu.memory_space<vmem>>, vector<1x4x1x16xf32>
    %62 = vector.shape_cast %61 : vector<1x4x1x16xf32> to vector<4x1x16xf32>
    %63 = vector.extract_strided_slice %11 {offsets = [0, 2, 2], sizes = [4, 16, 16], strides = [1, 1, 1]} : vector<4x18x18xf32> to vector<4x16x16xf32>
    %64 = vector.broadcast %62 : vector<4x1x16xf32> to vector<4x16x16xf32>
    %65 = arith.mulf %64, %63 : vector<4x16x16xf32>
    %66 = arith.addf %60, %65 : vector<4x16x16xf32>
    %c0_52 = arith.constant 0 : index
    %c0_53 = arith.constant 0 : index
    %c0_54 = arith.constant 0 : index
    %c0_55 = arith.constant 0 : index
    %67 = vector.load %arg3[%c0_52, %c0_53, %c0_54, %c0_55] : memref<2x4x16x16xf32, #tpu.memory_space<vmem>>, vector<1x4x16x16xf32>
    %68 = vector.shape_cast %67 : vector<1x4x16x16xf32> to vector<4x16x16xf32>
    %69 = vector.shape_cast %66 : vector<4x16x16xf32> to vector<1x4x16x16xf32>
    tpu.vector_store %arg3[%c0_52, %c0_53, %c0_54, %c0_55], %69 {strides = array<i32>} : memref<2x4x16x16xf32, #tpu.memory_space<vmem>>, vector<1x4x16x16xf32>,
    %c1_56 = arith.constant 1 : index
    %c0_57 = arith.constant 0 : index
    %c0_58 = arith.constant 0 : index
    %c0_59 = arith.constant 0 : index
    %70 = vector.load %arg1[%c1_56, %c0_57, %c0_58, %c0_59] : memref<2x4x16x16xf32, #tpu.memory_space<vmem>>, vector<1x4x16x16xf32>
    %71 = vector.shape_cast %70 : vector<1x4x16x16xf32> to vector<4x16x16xf32>
    %c0_60 = arith.constant 0 : index
    %c1_61 = arith.constant 1 : index
    %c1_62 = arith.constant 1 : index
    %72 = vector.load %arg4[%c0_60, %c1_61, %c1_62] : memref<4x18x18xf32, #tpu.memory_space<vmem>>, vector<4x16x16xf32>
    tpu.vector_store %arg4[%c0_60, %c1_61, %c1_62], %71 {strides = array<i32>} : memref<4x18x18xf32, #tpu.memory_space<vmem>>, vector<4x16x16xf32>,
    %c0_63 = arith.constant 0 : index
    %c0_64 = arith.constant 0 : index
    %c0_65 = arith.constant 0 : index
    %73 = vector.load %arg4[%c0_63, %c0_64, %c0_65] : memref<4x18x18xf32, #tpu.memory_space<vmem>>, vector<4x18x18xf32>
    %cst_66 = arith.constant 0.000000e+00 : f32
    %74 = vector.broadcast %cst_66 : f32 to vector<4x16x16xf32>
    %c0_67 = arith.constant 0 : index
    %c0_68 = arith.constant 0 : index
    %c0_69 = arith.constant 0 : index
    %c0_70 = arith.constant 0 : index
    %75 = vector.load %arg2[%c0_67, %c0_68, %c0_69, %c0_70] : memref<9x4x1x16xf32, #tpu.memory_space<vmem>>, vector<1x4x1x16xf32>
    %76 = vector.shape_cast %75 : vector<1x4x1x16xf32> to vector<4x1x16xf32>
    %77 = vector.extract_strided_slice %73 {offsets = [0, 0, 0], sizes = [4, 16, 16], strides = [1, 1, 1]} : vector<4x18x18xf32> to vector<4x16x16xf32>
    %78 = vector.broadcast %76 : vector<4x1x16xf32> to vector<4x16x16xf32>
    %79 = arith.mulf %78, %77 : vector<4x16x16xf32>
    %80 = arith.addf %74, %79 : vector<4x16x16xf32>
    %c1_71 = arith.constant 1 : index
    %c0_72 = arith.constant 0 : index
    %c0_73 = arith.constant 0 : index
    %c0_74 = arith.constant 0 : index
    %81 = vector.load %arg2[%c1_71, %c0_72, %c0_73, %c0_74] : memref<9x4x1x16xf32, #tpu.memory_space<vmem>>, vector<1x4x1x16xf32>
    %82 = vector.shape_cast %81 : vector<1x4x1x16xf32> to vector<4x1x16xf32>
    %83 = vector.extract_strided_slice %73 {offsets = [0, 0, 1], sizes = [4, 16, 16], strides = [1, 1, 1]} : vector<4x18x18xf32> to vector<4x16x16xf32>
    %84 = vector.broadcast %82 : vector<4x1x16xf32> to vector<4x16x16xf32>
    %85 = arith.mulf %84, %83 : vector<4x16x16xf32>
    %86 = arith.addf %80, %85 : vector<4x16x16xf32>
    %c2_75 = arith.constant 2 : index
    %c0_76 = arith.constant 0 : index
    %c0_77 = arith.constant 0 : index
    %c0_78 = arith.constant 0 : index
    %87 = vector.load %arg2[%c2_75, %c0_76, %c0_77, %c0_78] : memref<9x4x1x16xf32, #tpu.memory_space<vmem>>, vector<1x4x1x16xf32>
    %88 = vector.shape_cast %87 : vector<1x4x1x16xf32> to vector<4x1x16xf32>
    %89 = vector.extract_strided_slice %73 {offsets = [0, 0, 2], sizes = [4, 16, 16], strides = [1, 1, 1]} : vector<4x18x18xf32> to vector<4x16x16xf32>
    %90 = vector.broadcast %88 : vector<4x1x16xf32> to vector<4x16x16xf32>
    %91 = arith.mulf %90, %89 : vector<4x16x16xf32>
    %92 = arith.addf %86, %91 : vector<4x16x16xf32>
    %c3_79 = arith.constant 3 : index
    %c0_80 = arith.constant 0 : index
    %c0_81 = arith.constant 0 : index
    %c0_82 = arith.constant 0 : index
    %93 = vector.load %arg2[%c3_79, %c0_80, %c0_81, %c0_82] : memref<9x4x1x16xf32, #tpu.memory_space<vmem>>, vector<1x4x1x16xf32>
    %94 = vector.shape_cast %93 : vector<1x4x1x16xf32> to vector<4x1x16xf32>
    %95 = vector.extract_strided_slice %73 {offsets = [0, 1, 0], sizes = [4, 16, 16], strides = [1, 1, 1]} : vector<4x18x18xf32> to vector<4x16x16xf32>
    %96 = vector.broadcast %94 : vector<4x1x16xf32> to vector<4x16x16xf32>
    %97 = arith.mulf %96, %95 : vector<4x16x16xf32>
    %98 = arith.addf %92, %97 : vector<4x16x16xf32>
    %c4_83 = arith.constant 4 : index
    %c0_84 = arith.constant 0 : index
    %c0_85 = arith.constant 0 : index
    %c0_86 = arith.constant 0 : index
    %99 = vector.load %arg2[%c4_83, %c0_84, %c0_85, %c0_86] : memref<9x4x1x16xf32, #tpu.memory_space<vmem>>, vector<1x4x1x16xf32>
    %100 = vector.shape_cast %99 : vector<1x4x1x16xf32> to vector<4x1x16xf32>
    %101 = vector.extract_strided_slice %73 {offsets = [0, 1, 1], sizes = [4, 16, 16], strides = [1, 1, 1]} : vector<4x18x18xf32> to vector<4x16x16xf32>
    %102 = vector.broadcast %100 : vector<4x1x16xf32> to vector<4x16x16xf32>
    %103 = arith.mulf %102, %101 : vector<4x16x16xf32>
    %104 = arith.addf %98, %103 : vector<4x16x16xf32>
    %c5_87 = arith.constant 5 : index
    %c0_88 = arith.constant 0 : index
    %c0_89 = arith.constant 0 : index
    %c0_90 = arith.constant 0 : index
    %105 = vector.load %arg2[%c5_87, %c0_88, %c0_89, %c0_90] : memref<9x4x1x16xf32, #tpu.memory_space<vmem>>, vector<1x4x1x16xf32>
    %106 = vector.shape_cast %105 : vector<1x4x1x16xf32> to vector<4x1x16xf32>
    %107 = vector.extract_strided_slice %73 {offsets = [0, 1, 2], sizes = [4, 16, 16], strides = [1, 1, 1]} : vector<4x18x18xf32> to vector<4x16x16xf32>
    %108 = vector.broadcast %106 : vector<4x1x16xf32> to vector<4x16x16xf32>
    %109 = arith.mulf %108, %107 : vector<4x16x16xf32>
    %110 = arith.addf %104, %109 : vector<4x16x16xf32>
    %c6_91 = arith.constant 6 : index
    %c0_92 = arith.constant 0 : index
    %c0_93 = arith.constant 0 : index
    %c0_94 = arith.constant 0 : index
    %111 = vector.load %arg2[%c6_91, %c0_92, %c0_93, %c0_94] : memref<9x4x1x16xf32, #tpu.memory_space<vmem>>, vector<1x4x1x16xf32>
    %112 = vector.shape_cast %111 : vector<1x4x1x16xf32> to vector<4x1x16xf32>
    %113 = vector.extract_strided_slice %73 {offsets = [0, 2, 0], sizes = [4, 16, 16], strides = [1, 1, 1]} : vector<4x18x18xf32> to vector<4x16x16xf32>
    %114 = vector.broadcast %112 : vector<4x1x16xf32> to vector<4x16x16xf32>
    %115 = arith.mulf %114, %113 : vector<4x16x16xf32>
    %116 = arith.addf %110, %115 : vector<4x16x16xf32>
    %c7_95 = arith.constant 7 : index
    %c0_96 = arith.constant 0 : index
    %c0_97 = arith.constant 0 : index
    %c0_98 = arith.constant 0 : index
    %117 = vector.load %arg2[%c7_95, %c0_96, %c0_97, %c0_98] : memref<9x4x1x16xf32, #tpu.memory_space<vmem>>, vector<1x4x1x16xf32>
    %118 = vector.shape_cast %117 : vector<1x4x1x16xf32> to vector<4x1x16xf32>
    %119 = vector.extract_strided_slice %73 {offsets = [0, 2, 1], sizes = [4, 16, 16], strides = [1, 1, 1]} : vector<4x18x18xf32> to vector<4x16x16xf32>
    %120 = vector.broadcast %118 : vector<4x1x16xf32> to vector<4x16x16xf32>
    %121 = arith.mulf %120, %119 : vector<4x16x16xf32>
    %122 = arith.addf %116, %121 : vector<4x16x16xf32>
    %c8_99 = arith.constant 8 : index
    %c0_100 = arith.constant 0 : index
    %c0_101 = arith.constant 0 : index
    %c0_102 = arith.constant 0 : index
    %123 = vector.load %arg2[%c8_99, %c0_100, %c0_101, %c0_102] : memref<9x4x1x16xf32, #tpu.memory_space<vmem>>, vector<1x4x1x16xf32>
    %124 = vector.shape_cast %123 : vector<1x4x1x16xf32> to vector<4x1x16xf32>
    %125 = vector.extract_strided_slice %73 {offsets = [0, 2, 2], sizes = [4, 16, 16], strides = [1, 1, 1]} : vector<4x18x18xf32> to vector<4x16x16xf32>
    %126 = vector.broadcast %124 : vector<4x1x16xf32> to vector<4x16x16xf32>
    %127 = arith.mulf %126, %125 : vector<4x16x16xf32>
    %128 = arith.addf %122, %127 : vector<4x16x16xf32>
    %c1_103 = arith.constant 1 : index
    %c0_104 = arith.constant 0 : index
    %c0_105 = arith.constant 0 : index
    %c0_106 = arith.constant 0 : index
    %129 = vector.load %arg3[%c1_103, %c0_104, %c0_105, %c0_106] : memref<2x4x16x16xf32, #tpu.memory_space<vmem>>, vector<1x4x16x16xf32>
    %130 = vector.shape_cast %129 : vector<1x4x16x16xf32> to vector<4x16x16xf32>
    %131 = vector.shape_cast %128 : vector<4x16x16xf32> to vector<1x4x16x16xf32>
    tpu.vector_store %arg3[%c1_103, %c0_104, %c0_105, %c0_106], %131 {strides = array<i32>} : memref<2x4x16x16xf32, #tpu.memory_space<vmem>>, vector<1x4x16x16xf32>,
    return
  }
  func.func @transform_0(%arg0: i32) -> (i32, i32, i32, i32) {
    %c0_i32 = arith.constant 0 : i32
    %c0_i32_0 = arith.constant 0 : i32
    %c0_i32_1 = arith.constant 0 : i32
    %c0_i32_2 = arith.constant 0 : i32
    return %arg0, %c0_i32, %c0_i32_0, %c0_i32_1 : i32, i32, i32, i32
  }
  func.func @transform_1(%arg0: i32) -> (i32, i32, i32, i32) {
    %c0_i32 = arith.constant 0 : i32
    %c0_i32_0 = arith.constant 0 : i32
    %c0_i32_1 = arith.constant 0 : i32
    %c0_i32_2 = arith.constant 0 : i32
    %c0_i32_3 = arith.constant 0 : i32
    return %c0_i32, %c0_i32_0, %c0_i32_1, %c0_i32_2 : i32, i32, i32, i32
  }
  func.func @transform_2(%arg0: i32) -> (i32, i32, i32, i32) {
    %c0_i32 = arith.constant 0 : i32
    %c0_i32_0 = arith.constant 0 : i32
    %c0_i32_1 = arith.constant 0 : i32
    %c0_i32_2 = arith.constant 0 : i32
    return %arg0, %c0_i32, %c0_i32_0, %c0_i32_1 : i32, i32, i32, i32
  }
}

</mosaic_0001>

<bundles_post_ra>
// kernel: tpu_custom_call.1
= control target key start
LH: loop header
LB: loop body
LE: loop exit
PB: predicated region body
PF: predicated region fallthrough
CT: control target
= control target key end

     0   :  { %7 = vsyncpa [#allocation4], 0  ;;  %s2653_s0 = inlined_call_operand.hbm [shape: f32[2,4,16,16], index: 0, kind: input, shape index: {}]   ;;  %s2654_s1 = inlined_call_operand.hbm [shape: f32[9,4,1,16], index: 1, kind: input, shape index: {}]   ;;  %s2655_s2 = inlined_call_operand.hbm [shape: f32[2,4,16,16], index: 2, kind: output, shape index: {}]  }
   0x1   :  { %8 = vsyncpa [#allocation7], 0 }
   0x2   :  { %9 = vsyncpa [#allocation5], 0  ;;  %s1759_s9 = smov [#allocation3]   ;;  %s1687_s13 = scalar_lea.hbm %s2653_s0, 2048 }
   0x3   :  { %s15_s10 = sshll.u32 %s1759_s9, 4  ;;  %p1688_p0 = scmp.ne.s32.totalorder %s2653_s0, %s1687_s13  ;;  %s16_s10 = int_to_ptr.vmem [resolvable:$true] %s15_s10 }
   0x4   :  { %p1691_p1 = scmp.lt.u32.totalorder %s1687_s13, %s2653_s0 }
   0x6   :  { %p1693_p2 = pnand %p1691_p1, %p1688_p0 }
   0x8   :  { %1696 = shalt.err (!%p1693_p2)
}
   0x9   :  { %s1697_s18 = scalar_lea.vmem %s16_s10, 2048  ;;  %p1702_p4 = scmp.lt.s32.totalorder %s16_s10, %s16_s10 }
   0xa   :  { %p1698_p3 = scmp.ne.s32.totalorder %s16_s10, %s1697_s18  ;;  %p1703_p5 = scmp.lt.s32.totalorder %s1697_s18, %s1697_s18 }
   0xc   :  { %p1704_p6 = por %p1703_p5, %p1702_p4 }
   0xe   :  { %p1705_p7 = pnand %p1704_p6, %p1698_p3 }
  0x10   :  { %1708 = shalt.err (!%p1705_p7)
}
  0x11   :  { %s1760_s19 = smov 128   ;;  %s1761_s20 = smov 8  }
  0x12   :  { %21 = dma.hbm_to_vmem [thread:$0]  %s2653_s0, 2048, %s16_s10, [#allocation4], %s1760_s19, %s1760_s19, %s1761_s20  }
  0x13   :  { %s1762_s23 = smov [#allocation6]   ;;  %s1709_s27 = scalar_lea.hbm %s2654_s1, 576 }
  0x14   :  { %s27_s24 = sshll.u32 %s1762_s23, 4  ;;  %p1710_p8 = scmp.ne.s32.totalorder %s2654_s1, %s1709_s27  ;;  %s28_s24 = int_to_ptr.vmem [resolvable:$true] %s27_s24 }
  0x15   :  { %p1713_p9 = scmp.lt.u32.totalorder %s1709_s27, %s2654_s1 }
  0x17   :  { %p1715_p10 = pnand %p1713_p9, %p1710_p8 }
  0x19   :  { %1718 = shalt.err (!%p1715_p10)
}
  0x1a   :  { %s1719_s4 = scalar_lea.vmem %s28_s24, 576  ;;  %p1724_p12 = scmp.lt.s32.totalorder %s28_s24, %s28_s24 }
  0x1b   :  { %p1720_p11 = scmp.ne.s32.totalorder %s28_s24, %s1719_s4  ;;  %p1725_p13 = scmp.lt.s32.totalorder %s1719_s4, %s1719_s4 }
  0x1d   :  { %p1726_p0 = por %p1725_p13, %p1724_p12 }
  0x1f   :  { %p1727_p1 = pnand %p1726_p0, %p1720_p11 }
  0x21   :  { %1730 = shalt.err (!%p1727_p1)
}
  0x22   :  { %s1763_s0 = smov 16   ;;  %s1764_s5 = smov 1  }
  0x23   :  { %33 = dma.hbm_to_vmem [thread:$0]  %s2654_s1, 576, %s28_s24, [#allocation7], %s1763_s0, %s1763_s0, %s1764_s5  }
  0x24   :  { %1753 = dma.done.wait [#allocation4], 2048  }
  0x25   :  { %1754 = vsyncadd [#allocation4], 4294965248 }
  0x26   :  { %1755 = dma.done.wait [#allocation7], 576  }
  0x27   :  { %1756 = vsyncadd [#allocation7], 4294966720  ;;  %vm40_vm0 = vcmask 139264   ;;  %vm49_vm1 = vcmask 7168   ;;  %vm63_vm2 = vcmask 146568   ;;  %v1765_v0 = vmov 0.0  }
  0x28   :  { %42 = vst.msk [vmem:[#allocation2 + $0x18] sm:$0x1] %vm40_vm0, %v1765_v0  ;;  %41 = vst.msk [vmem:[#allocation2] sm:$0x1] %vm40_vm0, %v1765_v0  ;;  %vm52_vm3 = vcmask 1024   ;;  %vm66_vm4 = vcmask 140424  }
  0x29   :  { %55 = vst.msk [vmem:[#allocation2 + $0x20] sm:$0xff] %vm49_vm1, %v1765_v0  ;;  %51 = vst.msk [vmem:[#allocation2 + $0x8] sm:$0xff] %vm49_vm1, %v1765_v0  ;;  %v79_v1 = vld [vmem:[#allocation3 + $0x10] sm:$0xff]  ;;  %v77_v2 = vld [vmem:[#allocation3] sm:$0xff]  ;;  %vm117_vm5 = vcmask 138248   ;;  %s1766_s1 = smov 127  }
  0x2a   :  { %43 = vst.msk [vmem:[#allocation2 + $0x30] sm:$0x1] %vm40_vm0, %v1765_v0  ;;  %44 = vst.msk [vmem:[#allocation2 + $0x48] sm:$0x1] %vm40_vm0, %v1765_v0  ;;  %97 = vrot.lane.b32.xlu1 %v79_v1, %s1764_s5  ;;  %93 = vrot.lane.b32.xlu0 %v77_v2, %s1764_s5  ;;  %v80_v3 = vld [vmem:[#allocation3 + $0x18] sm:$0xff]  ;;  %v78_v4 = vld [vmem:[#allocation3 + $0x8] sm:$0xff] }
  0x2b   :  { %45 = vst.msk [vmem:[#allocation2 + $0x11] sm:$0x1] %vm40_vm0, %v1765_v0  ;;  %46 = vst.msk [vmem:[#allocation2 + $0x29] sm:$0x1] %vm40_vm0, %v1765_v0  ;;  %v81_v5 = vld [vmem:[#allocation3 + $0x20] sm:$0xff]  ;;  %v82_v6 = vld [vmem:[#allocation3 + $0x28] sm:$0xff] }
  0x2c   :  { %47 = vst.msk [vmem:[#allocation2 + $0x41] sm:$0x1] %vm40_vm0, %v1765_v0  ;;  %48 = vst.msk [vmem:[#allocation2 + $0x59] sm:$0x1] %vm40_vm0, %v1765_v0  ;;  %v83_v7 = vld [vmem:[#allocation3 + $0x30] sm:$0xff]  ;;  %v84_v8 = vld [vmem:[#allocation3 + $0x38] sm:$0xff] }
  0x2d   :  { %58 = vst.msk [vmem:[#allocation2 + $0x38] sm:$0xff] %vm49_vm1, %v1765_v0  ;;  %61 = vst.msk [vmem:[#allocation2 + $0x50] sm:$0xff] %vm49_vm1, %v1765_v0  ;;  %v838_v9 = vld [vmem:[#allocation3 + $0x40] sm:$0xff]  ;;  %v839_v10 = vld [vmem:[#allocation3 + $0x48] sm:$0xff]  ;;  %vm381_vm6 = vcmask 1046528   ;;  %s1767_s8 = smov 126  }
  0x2e   :  { %54 = vst.msk [vmem:[#allocation2 + $0x18] sm:$0xff] %vm49_vm1, %v1765_v0  ;;  %50 = vst.msk [vmem:[#allocation2] sm:$0xff] %vm49_vm1, %v1765_v0  ;;  %99 = vrot.lane.b32.xlu1 %v80_v3, %s1764_s5  ;;  %95 = vrot.lane.b32.xlu0 %v78_v4, %s1764_s5  ;;  %v840_v11 = vld [vmem:[#allocation3 + $0x50] sm:$0xff]  ;;  %v841_v12 = vld [vmem:[#allocation3 + $0x58] sm:$0xff]  ;;  %vm633_vm7 = vcmask 1045504   ;;  %vm828_vm8 = vcmask 130048  }
  0x2f   :  { %69 = vst.msk [vmem:[#allocation2 + $0x20] sm:$0xff] %vm63_vm2, %v1765_v0  ;;  %65 = vst.msk [vmem:[#allocation2 + $0x8] sm:$0xff] %vm63_vm2, %v1765_v0  ;;  %v842_v13 = vld [vmem:[#allocation3 + $0x60] sm:$0xff]  ;;  %v843_v14 = vld [vmem:[#allocation3 + $0x68] sm:$0xff]  ;;  %s1768_s9 = smov [#allocation8]  }
  0x30   :  { %57 = vst.msk [vmem:[#allocation2 + $0x30] sm:$0xff] %vm49_vm1, %v1765_v0  ;;  %60 = vst.msk [vmem:[#allocation2 + $0x48] sm:$0xff] %vm49_vm1, %v1765_v0  ;;  %v844_v15 = vld [vmem:[#allocation3 + $0x70] sm:$0xff]  ;;  %v845_v16 = vld [vmem:[#allocation3 + $0x78] sm:$0xff]  ;;  %s1592_s10 = sshll.u32 %s1768_s9, 4  ;;  %s1593_s10 = int_to_ptr.vmem [resolvable:$true] %s1592_s10 }
  0x31   :  { %72 = vst.msk [vmem:[#allocation2 + $0x38] sm:$0xff] %vm63_vm2, %v1765_v0  ;;  %75 = vst.msk [vmem:[#allocation2 + $0x50] sm:$0xff] %vm63_vm2, %v1765_v0  ;;  %v1868_v28 = vld [vmem:[#allocation6 + $0xc] ss:$0 sm:$0xff]  ;;  %v1882_v34 = vld [vmem:[#allocation6 + $0xd] ss:$0 sm:$0xff]  ;;  %p1736_p3 = scmp.lt.s32.totalorder %s1593_s10, %s1593_s10 }
  0x32   :  { %56 = vst.msk [vmem:[#allocation2 + $0x28] sm:$0x3] %vm52_vm3, %v1765_v0  ;;  %53 = vst.msk [vmem:[#allocation2 + $0x10] sm:$0x3] %vm52_vm3, %v1765_v0  ;;  %101 = vrot.lane.b32.xlu0 %v81_v5, %s1764_s5  ;;  %103 = vrot.lane.b32.xlu1 %v82_v6, %s1764_s5  ;;  %v1906_v48 = vld [vmem:[#allocation6 + $0xe] ss:$0 sm:$0xff] }
  0x33   :  { %59 = vst.msk [vmem:[#allocation2 + $0x40] sm:$0x3] %vm52_vm3, %v1765_v0  ;;  %62 = vst.msk [vmem:[#allocation2 + $0x58] sm:$0x3] %vm52_vm3, %v1765_v0  ;;  %v1923_v56 = vld [vmem:[#allocation6 + $0xf] ss:$0 sm:$0xff] }
  0x34   :  { %68 = vst.msk [vmem:[#allocation2 + $0x18] sm:$0xff] %vm63_vm2, %v1765_v0  ;;  %64 = vst.msk [vmem:[#allocation2] sm:$0xff] %vm63_vm2, %v1765_v0  ;;  %s1731_s11 = scalar_lea.vmem %s1593_s10, 2048 }
  0x35   :  { %70 = vst.msk [vmem:[#allocation2 + $0x28] sm:$0x3] %vm66_vm4, %v1765_v0  ;;  %67 = vst.msk [vmem:[#allocation2 + $0x10] sm:$0x3] %vm66_vm4, %v1765_v0  ;;  %p1732_p2 = scmp.ne.s32.totalorder %s1593_s10, %s1731_s11  ;;  %p1737_p4 = scmp.lt.s32.totalorder %s1731_s11, %s1731_s11 }
  0x36   :  { %71 = vst.msk [vmem:[#allocation2 + $0x30] sm:$0xff] %vm63_vm2, %v1765_v0  ;;  %74 = vst.msk [vmem:[#allocation2 + $0x48] sm:$0xff] %vm63_vm2, %v1765_v0  ;;  %105 = vrot.lane.b32.xlu0 %v83_v7, %s1764_s5  ;;  %107 = vrot.lane.b32.xlu1 %v84_v8, %s1764_s5 }
  0x37   :  { %73 = vst.msk [vmem:[#allocation2 + $0x40] sm:$0x3] %vm66_vm4, %v1765_v0  ;;  %76 = vst.msk [vmem:[#allocation2 + $0x58] sm:$0x3] %vm66_vm4, %v1765_v0  ;;  %p1738_p5 = por %p1737_p4, %p1736_p3 }
  0x39   :  { %p1739_p6 = pnand %p1738_p5, %p1732_p2 }
  0x3a   :  { %854 = vrot.lane.b32.xlu1 %v838_v9, %s1764_s5  ;;  %856 = vrot.lane.b32.xlu0 %v839_v10, %s1764_s5 }
  0x3e   :  { %858 = vrot.lane.b32.xlu1 %v840_v11, %s1764_s5  ;;  %860 = vrot.lane.b32.xlu0 %v841_v12, %s1764_s5 }
  0x42   :  { %862 = vrot.lane.b32.xlu1 %v842_v13, %s1764_s5  ;;  %864 = vrot.lane.b32.xlu0 %v843_v14, %s1764_s5  ;;  %v1964_v14 = vld [vmem:[#allocation6 + $0x18] ss:$0 sm:$0xff] }
  0x46   :  { %866 = vrot.lane.b32.xlu1 %v844_v15, %s1764_s5  ;;  %868 = vrot.lane.b32.xlu0 %v845_v16, %s1764_s5 }
  0x9c   :  { %v98_v17 = vpop.permute.xlu1 %97  ;;  %v94_v18 = vpop.permute.xlu0 %93 }
  0x9d   :  { %120 = vst.msk [vmem:[#allocation2 + $0x19] sm:$0xff] %vm117_vm5, %v98_v17  ;;  %118 = vst.msk [vmem:[#allocation2 + $0x1] sm:$0xff] %vm117_vm5, %v94_v18 }
  0xa0   :  { %v100_v19 = vpop.permute.xlu1 %99  ;;  %v96_v20 = vpop.permute.xlu0 %95 }
  0xa1   :  { %121 = vst.msk [vmem:[#allocation2 + $0x21] sm:$0xff] %vm117_vm5, %v100_v19  ;;  %119 = vst.msk [vmem:[#allocation2 + $0x9] sm:$0xff] %vm117_vm5, %v96_v20  ;;  %v1971_v19 = vld [vmem:[#allocation6 + $0x19] ss:$0 sm:$0xff] }
  0xa4   :  { %v102_v21 = vpop.permute.xlu0 %101  ;;  %v1852_v22 = vld [vmem:[#allocation2] sm:$0xff]  ;;  %v104_v23 = vpop.permute.xlu1 %103  ;;  %v1858_v24 = vld [vmem:[#allocation2 + $0x18] sm:$0xff] }
  0xa5   :  { %122 = vst.msk [vmem:[#allocation2 + $0x31] sm:$0xff] %vm117_vm5, %v102_v21  ;;  %219 = vrot.lane.b32.xlu0 %v1852_v22, %s1766_s1  ;;  %123 = vst.msk [vmem:[#allocation2 + $0x39] sm:$0xff] %vm117_vm5, %v104_v23  ;;  %v357_v36 = vmul.f32 %v1868_v28, %v1852_v22  ;;  %v360_v43 = vmul.f32 %v1882_v34, %v1858_v24  ;;  %v456_v20 = vrot.slane %v1858_v24, 1  ;;  %v451_v23 = vrot.slane %v1852_v22, 1 }
  0xa7   :  { %v382_v46 = vrot.slane %v357_v36, 1  ;;  %v387_v53 = vrot.slane %v360_v43, 1 }
  0xa8   :  { %v106_v25 = vpop.permute.xlu0 %105  ;;  %v1860_v26 = vld [vmem:[#allocation2 + $0x8] sm:$0xff]  ;;  %v108_v27 = vpop.permute.xlu1 %107  ;;  %v1870_v29 = vld [vmem:[#allocation2 + $0x20] sm:$0xff]  ;;  %v1874_v31 = vld [vmem:[#allocation2 + $0x10] sm:$0x3] }
  0xa9   :  { %124 = vst.msk [vmem:[#allocation2 + $0x49] sm:$0xff] %vm117_vm5, %v106_v25  ;;  %221 = vrot.lane.b32.xlu1 %v1860_v26, %s1766_s1  ;;  %223 = vrot.lane.b32.xlu0 %v1858_v24, %s1766_s1  ;;  %125 = vst.msk [vmem:[#allocation2 + $0x51] sm:$0xff] %vm117_vm5, %v108_v27  ;;  %v1890_v38 = vld [vmem:[#allocation2 + $0x28] sm:$0x3]  ;;  %v358_v41 = vmul.f32 %v1868_v28, %v1860_v26  ;;  %v359_v42 = vmul.f32 %v1868_v28, %v1874_v31  ;;  %v452_v15 = vrot.slane %v1860_v26, 1 }
  0xaa   :  { %v361_v52 = vmul.f32 %v1882_v34, %v1870_v29  ;;  %v362_v54 = vmul.f32 %v1882_v34, %v1890_v38  ;;  %v454_v16 = vrot.slane %v1874_v31, 1  ;;  %v457_v21 = vrot.slane %v1870_v29, 1 }
  0xab   :  { %v383_v45 = vrot.slane %v358_v41, 1  ;;  %v385_v47 = vrot.slane %v359_v42, 1  ;;  %v609_v27 = vmul.f32 %v1964_v14, %v1852_v22  ;;  %v1990_v36 = vsel %vm381_vm6, %v451_v23, %v452_v15 }
  0xac   :  { %v1872_v30 = vld [vmem:[#allocation2 + $0x30] sm:$0xff]  ;;  %v855_v32 = vpop.permute.xlu1 %854  ;;  %v857_v33 = vpop.permute.xlu0 %856  ;;  %v1884_v35 = vld [vmem:[#allocation2 + $0x38] sm:$0xff]  ;;  %v1908_v49 = vld [vmem:[#allocation2 + $0x40] sm:$0x3]  ;;  %v388_v58 = vrot.slane %v361_v52, 1  ;;  %v390_v59 = vrot.slane %v362_v54, 1  ;;  %v1997_v41 = vsel %vm381_vm6, %v456_v20, %v457_v21  ;;  %v611_v52 = vmul.f32 %v1964_v14, %v1874_v31 }
  0xad   :  { %225 = vrot.lane.b32.xlu1 %v1870_v29, %s1766_s1  ;;  %227 = vrot.lane.b32.xlu0 %v1872_v30, %s1766_s1  ;;  %878 = vst.msk [vmem:[#allocation2 + $0x1] sm:$0xff] %vm117_vm5, %v855_v32  ;;  %879 = vst.msk [vmem:[#allocation2 + $0x9] sm:$0xff] %vm117_vm5, %v857_v33  ;;  %v1921_v55 = vsel %vm381_vm6, %v382_v46, %v383_v45  ;;  %v1926_v57 = vsel %vm381_vm6, %v383_v45, %v385_v47  ;;  %v461_v42 = vrot.slane %v1872_v30, 1  ;;  %v2002_v46 = vld [vmem:[#allocation6 + $0x1a] ss:$0 sm:$0xff] }
  0xae   :  { %v363_v60 = vmul.f32 %v1906_v48, %v1872_v30  ;;  %v364_v61 = vmul.f32 %v1906_v48, %v1884_v35  ;;  %v365_v62 = vmul.f32 %v1906_v48, %v1908_v49  ;;  %v1937_v2 = vsel %vm381_vm6, %v387_v53, %v388_v58  ;;  %v2007_v53 = vld [vmem:[#allocation6 + $0x1b] ss:$0 sm:$0xff] }
  0xaf   :  { %v1940_v3 = vsel %vm381_vm6, %v388_v58, %v390_v59  ;;  %v610_v32 = vmul.f32 %v1964_v14, %v1860_v26  ;;  %v612_v33 = vmul.f32 %v1971_v19, %v1858_v24  ;;  %v462_v43 = vrot.slane %v1884_v35, 1 }
  0xb0   :  { %v1888_v37 = vld [vmem:[#allocation2 + $0x48] sm:$0xff]  ;;  %v859_v39 = vpop.permute.xlu1 %858  ;;  %v861_v40 = vpop.permute.xlu0 %860  ;;  %v1904_v44 = vld [vmem:[#allocation2 + $0x50] sm:$0xff]  ;;  %v1934_v63 = vld [vmem:[#allocation2 + $0x58] sm:$0x3]  ;;  %v392_v4 = vrot.slane %v363_v60, 1  ;;  %v393_v6 = vrot.slane %v364_v61, 1  ;;  %v613_v59 = vmul.f32 %v1971_v19, %v1870_v29 }
  0xb1   :  { %229 = vrot.lane.b32.xlu1 %v1884_v35, %s1766_s1  ;;  %231 = vrot.lane.b32.xlu0 %v1888_v37, %s1766_s1  ;;  %880 = vst.msk [vmem:[#allocation2 + $0x19] sm:$0xff] %vm117_vm5, %v859_v39  ;;  %881 = vst.msk [vmem:[#allocation2 + $0x21] sm:$0xff] %vm117_vm5, %v861_v40  ;;  %v366_v5 = vmul.f32 %v1923_v56, %v1888_v37  ;;  %v395_v7 = vrot.slane %v365_v62, 1  ;;  %v367_v8 = vmul.f32 %v1923_v56, %v1904_v44 }
  0xb2   :  { %v1953_v10 = vsel %vm381_vm6, %v392_v4, %v393_v6  ;;  %v368_v13 = vmul.f32 %v1923_v56, %v1934_v63  ;;  %v1993_v39 = vsel %vm381_vm6, %v452_v15, %v454_v16  ;;  %v459_v40 = vrot.slane %v1890_v38, 1 }
  0xb3   :  { %v397_v9 = vrot.slane %v366_v5, 1  ;;  %v1956_v11 = vsel %vm381_vm6, %v393_v6, %v395_v7  ;;  %v398_v12 = vrot.slane %v367_v8, 1  ;;  %v464_v45 = vrot.slane %v1908_v49, 1 }
  0xb4   :  { %v863_v50 = vpop.permute.xlu1 %862  ;;  %v865_v51 = vpop.permute.xlu0 %864  ;;  %v400_v18 = vrot.slane %v368_v13, 1  ;;  %v466_v47 = vrot.slane %v1888_v37, 1  ;;  %v467_v54 = vrot.slane %v1904_v44, 1  ;;  %v469_v58 = vrot.slane %v1934_v63, 1 }
  0xb5   :  { %233 = vrot.lane.b32.xlu1 %v1904_v44, %s1766_s1  ;;  %288 = vrot.lane.b32.xlu0 %v1852_v22, %s1767_s8  ;;  %882 = vst.msk [vmem:[#allocation2 + $0x31] sm:$0xff] %vm117_vm5, %v863_v50  ;;  %883 = vst.msk [vmem:[#allocation2 + $0x39] sm:$0xff] %vm117_vm5, %v865_v51  ;;  %v1969_v17 = vsel %vm381_vm6, %v397_v9, %v398_v12  ;;  %v634_v50 = vrot.slane %v609_v27, 2  ;;  %v635_v51 = vrot.slane %v610_v32, 2  ;;  %v639_v60 = vrot.slane %v612_v33, 2  ;;  %v2047_v33 = vld [vmem:[#allocation2 + $0x8] sm:$0xff] }
  0xb6   :  { %v1977_v25 = vsel %vm381_vm6, %v398_v12, %v400_v18  ;;  %v637_v62 = vrot.slane %v611_v52, 2  ;;  %v640_v4 = vrot.slane %v613_v59, 2  ;;  %v616_v5 = vmul.f32 %v2002_v46, %v1884_v35 }
  0xb7   :  { %v2018_v61 = vsel %vm633_vm7, %v634_v50, %v635_v51  ;;  %v617_v6 = vmul.f32 %v2002_v46, %v1908_v49  ;;  %v618_v7 = vmul.f32 %v2007_v53, %v1888_v37  ;;  %v619_v13 = vmul.f32 %v2007_v53, %v1904_v44  ;;  %v2049_v50 = vld [vmem:[#allocation2 + $0x10] sm:$0x3] }
  0xb8   :  { %v867_v0 = vpop.permute.xlu1 %866  ;;  %v869_v1 = vpop.permute.xlu0 %868  ;;  %v2031_v8 = vsel %vm633_vm7, %v635_v51, %v637_v62  ;;  %v2040_v15 = vsel %vm633_vm7, %v639_v60, %v640_v4  ;;  %v645_v16 = vrot.slane %v616_v5, 2  ;;  %v620_v32 = vmul.f32 %v2007_v53, %v1934_v63  ;;  %v2063_v62 = vld [vmem:[#allocation2 + $0x20] sm:$0xff] }
  0xb9   :  { %290 = vrot.lane.b32.xlu1 %v1860_v26, %s1767_s8  ;;  %292 = vrot.lane.b32.xlu0 %v1858_v24, %s1767_s8  ;;  %884 = vst.msk [vmem:[#allocation2 + $0x49] sm:$0xff] %vm117_vm5, %v867_v0  ;;  %885 = vst.msk [vmem:[#allocation2 + $0x51] sm:$0xff] %vm117_vm5, %v869_v1  ;;  %v614_v0 = vmul.f32 %v1971_v19, %v1890_v38  ;;  %v615_v1 = vmul.f32 %v2002_v46, %v1872_v30  ;;  %v647_v18 = vrot.slane %v617_v6, 2  ;;  %v2083_v5 = vld [vmem:[#allocation2] sm:$0xff] }
  0xba   :  { %2662 = vst [vmem:[#allocation12_spill] sm:$0xff] %v2031_v8  ;;  %2663 = vst [vmem:[#allocation13_spill] sm:$0xff] %v2040_v15  ;;  %v649_v20 = vrot.slane %v618_v7, 2  ;;  %v650_v27 = vrot.slane %v619_v13, 2  ;;  %v2058_v59 = vsel %vm381_vm6, %v457_v21, %v459_v40  ;;  %v2061_v60 = vsel %vm381_vm6, %v461_v42, %v462_v43  ;;  %v2087_v7 = vld [vmem:[#allocation2 + $0x18] sm:$0xff] }
  0xbb   :  { %v642_v9 = vrot.slane %v614_v0, 2  ;;  %v644_v12 = vrot.slane %v615_v1, 2  ;;  %v2055_v52 = vsel %vm633_vm7, %v645_v16, %v647_v18  ;;  %v2065_v0 = vld [vmem:[#allocation2 + $0x28] sm:$0x3]  ;;  %v2075_v21 = vsel %vm381_vm6, %v462_v43, %v464_v45 }
  0xbc   :  { %2666 = vst [vmem:[#allocation16_spill] sm:$0xff] %v2055_v52  ;;  %v2068_v1 = vsel %vm633_vm7, %v649_v20, %v650_v27  ;;  %v2078_v40 = vsel %vm381_vm6, %v466_v47, %v467_v54  ;;  %v2081_v42 = vsel %vm381_vm6, %v467_v54, %v469_v58  ;;  %v2085_v6 = vld [vmem:[#allocation2 + $0x38] sm:$0xff]  ;;  %v1114_v43 = vmul.f32 %v1868_v28, %v2083_v5  ;;  %v2100_v54 = vld [vmem:[#allocation2 + $0x40] sm:$0x3] }
  0xbd   :  { %294 = vrot.lane.b32.xlu1 %v1870_v29, %s1767_s8  ;;  %296 = vrot.lane.b32.xlu0 %v1872_v30, %s1767_s8  ;;  %v2043_v23 = vsel %vm633_vm7, %v640_v4, %v642_v9  ;;  %v2052_v51 = vsel %vm633_vm7, %v644_v12, %v645_v16  ;;  %2667 = vst [vmem:[#allocation17_spill] sm:$0xff] %v2068_v1  ;;  %v652_v4 = vrot.slane %v620_v32, 2  ;;  %v2089_v9 = vld [vmem:[#allocation2 + $0x30] sm:$0xff] }
  0xbe   :  { %2664 = vst [vmem:[#allocation14_spill] sm:$0xff] %v2043_v23  ;;  %2665 = vst [vmem:[#allocation15_spill] sm:$0xff] %v2052_v51  ;;  %v1115_v45 = vmul.f32 %v1868_v28, %v2047_v33  ;;  %v1116_v47 = vmul.f32 %v1868_v28, %v2049_v50  ;;  %v1117_v58 = vmul.f32 %v1882_v34, %v2087_v7 }
  0xbf   :  { %v2092_v12 = vsel %vm633_vm7, %v650_v27, %v652_v4  ;;  %v1118_v13 = vmul.f32 %v1882_v34, %v2063_v62  ;;  %v1119_v16 = vmul.f32 %v1882_v34, %v2065_v0  ;;  %v1120_v18 = vmul.f32 %v1906_v48, %v2089_v9 }
  0xc0   :  { %2668 = vst [vmem:[#allocation18_spill] sm:$0xff] %v2092_v12  ;;  %v2110_v20 = vld [vmem:[#allocation2 + $0x50] sm:$0xff]  ;;  %v1138_v27 = vrot.slane %v1114_v43, 1  ;;  %v1139_v32 = vrot.slane %v1115_v45, 1  ;;  %v1141_v4 = vrot.slane %v1116_v47, 1  ;;  %v1121_v28 = vmul.f32 %v1906_v48, %v2085_v6  ;;  %v2120_v23 = vld [vmem:[#allocation2 + $0x48] sm:$0xff] }
  0xc1   :  { %298 = vrot.lane.b32.xlu1 %v1884_v35, %s1767_s8  ;;  %300 = vrot.lane.b32.xlu0 %v1888_v37, %s1767_s8  ;;  %v2118_v12 = vld [vmem:[#allocation2 + $0x58] sm:$0x3]  ;;  %v1143_v34 = vrot.slane %v1117_v58, 1  ;;  %v1144_v1 = vrot.slane %v1118_v13, 1  ;;  %v1146_v52 = vrot.slane %v1119_v16, 1  ;;  %v1148_v51 = vrot.slane %v1120_v18, 1 }
  0xc2   :  { %v2123_v43 = vsel %vm381_vm6, %v1138_v27, %v1139_v32  ;;  %v2126_v45 = vsel %vm381_vm6, %v1139_v32, %v1141_v4  ;;  %v1149_v47 = vrot.slane %v1121_v28, 1  ;;  %v1122_v15 = vmul.f32 %v1906_v48, %v2100_v54 }
  0xc3   :  { %v2131_v8 = vsel %vm381_vm6, %v1143_v34, %v1144_v1  ;;  %v2134_v58 = vsel %vm381_vm6, %v1144_v1, %v1146_v52  ;;  %v1123_v13 = vmul.f32 %v1923_v56, %v2120_v23  ;;  %v1124_v16 = vmul.f32 %v1923_v56, %v2110_v20 }
  0xc4   :  { %2669 = vst [vmem:[#allocation19_spill] sm:$0xff] %v2134_v58  ;;  %v2141_v18 = vsel %vm381_vm6, %v1148_v51, %v1149_v47  ;;  %v1151_v27 = vrot.slane %v1122_v15, 1  ;;  %v1125_v32 = vmul.f32 %v1923_v56, %v2118_v12  ;;  %v1362_v48 = vmul.f32 %v1964_v14, %v2083_v5 }
  0xc5   :  { %302 = vrot.lane.b32.xlu1 %v1904_v44, %s1767_s8  ;;  %471 = vrot.lane.b32.xlu0 %v1990_v36, %s1766_s1  ;;  %2670 = vst [vmem:[#allocation20_spill] sm:$0xff] %v2141_v18  ;;  %v1153_v52 = vrot.slane %v1123_v13, 1  ;;  %v1154_v1 = vrot.slane %v1124_v16, 1  ;;  %v1363_v4 = vmul.f32 %v1964_v14, %v2047_v33  ;;  %v1364_v15 = vmul.f32 %v1964_v14, %v2049_v50 }
  0xc6   :  { %v2156_v51 = vsel %vm381_vm6, %v1149_v47, %v1151_v27  ;;  %v1156_v56 = vrot.slane %v1125_v32, 1  ;;  %v1386_v28 = vrot.slane %v1362_v48, 2  ;;  %v1365_v34 = vmul.f32 %v1971_v19, %v2087_v7 }
  0xc7   :  { %2671 = vst [vmem:[#allocation21_spill] sm:$0xff] %v2156_v51  ;;  %v2161_v18 = vsel %vm381_vm6, %v1153_v52, %v1154_v1  ;;  %v1389_v13 = vrot.slane %v1364_v15, 2  ;;  %v1366_v16 = vmul.f32 %v1971_v19, %v2063_v62  ;;  %v1367_v47 = vmul.f32 %v1971_v19, %v2065_v0 }
  0xc8   :  { %2672 = vst [vmem:[#allocation22_spill] sm:$0xff] %v2161_v18  ;;  %v2166_v58 = vsel %vm381_vm6, %v1154_v1, %v1156_v56  ;;  %v1391_v14 = vrot.slane %v1365_v34, 2  ;;  %v1368_v27 = vmul.f32 %v2002_v46, %v2089_v9  ;;  %v1369_v1 = vmul.f32 %v2002_v46, %v2085_v6 }
  0xc9   :  { %473 = vrot.lane.b32.xlu1 %v1993_v39, %s1766_s1  ;;  %475 = vrot.lane.b32.xlu0 %v1997_v41, %s1766_s1  ;;  %2673 = vst [vmem:[#allocation23_spill] sm:$0xff] %v2166_v58  ;;  %v1392_v52 = vrot.slane %v1366_v16, 2  ;;  %v1394_v19 = vrot.slane %v1367_v47, 2  ;;  %v1370_v15 = vmul.f32 %v2002_v46, %v2100_v54  ;;  %v1373_v34 = vmul.f32 %v2007_v53, %v2118_v12 }
  0xca   :  { %v1397_v56 = vrot.slane %v1369_v1, 2  ;;  %v700_v1 = vrot.slane %v1860_v26, 2 }
  0xcb   :  { %v1404_v47 = vrot.slane %v1373_v34, 2  ;;  %v712_v34 = vrot.slane %v1908_v49, 2 }
  0xcd   :  { %477 = vrot.lane.b32.xlu1 %v2058_v59, %s1766_s1  ;;  %479 = vrot.lane.b32.xlu0 %v2061_v60, %s1766_s1 }
  0xd1   :  { %481 = vrot.lane.b32.xlu1 %v2075_v21, %s1766_s1  ;;  %483 = vrot.lane.b32.xlu0 %v2078_v40, %s1766_s1 }
  0xd5   :  { %485 = vrot.lane.b32.xlu1 %v2081_v42, %s1766_s1  ;;  %540 = vrot.lane.b32.xlu0 %v1990_v36, %s1767_s8  ;;  %v1387_v36 = vrot.slane %v1363_v4, 2  ;;  %v1396_v4 = vrot.slane %v1368_v27, 2 }
  0xd7   :  { %v2177_v32 = vsel %vm633_vm7, %v1386_v28, %v1387_v36  ;;  %v2180_v48 = vsel %vm633_vm7, %v1387_v36, %v1389_v13  ;;  %v1372_v28 = vmul.f32 %v2007_v53, %v2110_v20  ;;  %v2196_v36 = vsel %vm633_vm7, %v1392_v52, %v1394_v19 }
  0xd8   :  { %2674 = vst [vmem:[#allocation24_spill] sm:$0xff] %v2177_v32  ;;  %2675 = vst [vmem:[#allocation25_spill] sm:$0xff] %v2180_v48  ;;  %v1399_v13 = vrot.slane %v1370_v15, 2  ;;  %v2203_v46 = vsel %vm633_vm7, %v1396_v4, %v1397_v56  ;;  %v702_v19 = vrot.slane %v1874_v31, 2  ;;  %v704_v4 = vrot.slane %v1858_v24, 2 }
  0xd9   :  { %542 = vrot.lane.b32.xlu1 %v1993_v39, %s1767_s8  ;;  %544 = vrot.lane.b32.xlu0 %v1997_v41, %s1767_s8  ;;  %v1371_v39 = vmul.f32 %v2007_v53, %v2120_v23  ;;  %v2189_v41 = vsel %vm633_vm7, %v1391_v14, %v1392_v52  ;;  %2677 = vst [vmem:[#allocation27_spill] sm:$0xff] %v2196_v36  ;;  %2678 = vst [vmem:[#allocation28_spill] sm:$0xff] %v2203_v46  ;;  %v1402_v14 = vrot.slane %v1372_v28, 2 }
  0xda   :  { %2676 = vst [vmem:[#allocation26_spill] sm:$0xff] %v2189_v41  ;;  %v2206_v27 = vsel %vm633_vm7, %v1397_v56, %v1399_v13  ;;  %v705_v15 = vrot.slane %v1870_v29, 2  ;;  %v709_v56 = vrot.slane %v1872_v30, 2  ;;  %v710_v28 = vrot.slane %v1884_v35, 2 }
  0xdb   :  { %v1401_v16 = vrot.slane %v1371_v39, 2  ;;  %2679 = vst [vmem:[#allocation29_spill] sm:$0xff] %v2206_v27  ;;  %v2212_v52 = vsel %vm633_vm7, %v1402_v14, %v1404_v47  ;;  %v703_v39 = vsel %vm633_vm7, %v700_v1, %v702_v19  ;;  %v715_v13 = vrot.slane %v1904_v44, 2 }
  0xdc   :  { %2681 = vst [vmem:[#allocation31_spill] sm:$0xff] %v2212_v52  ;;  %v717_v47 = vrot.slane %v1934_v63, 2  ;;  %v2274_v63 = vld [vmem:[#allocation6] ss:$0 sm:$0xff]  ;;  %v1216_v41 = vrot.slane %v2089_v9, 1 }
  0xdd   :  { %546 = vrot.lane.b32.xlu1 %v2058_v59, %s1767_s8  ;;  %548 = vrot.lane.b32.xlu0 %v2061_v60, %s1767_s8  ;;  %v2209_v53 = vsel %vm633_vm7, %v1401_v16, %v1402_v14  ;;  %v699_v59 = vrot.slane %v1852_v22, 2  ;;  %v713_v16 = vsel %vm633_vm7, %v710_v28, %v712_v34  ;;  %v2301_v34 = vld [vmem:[#allocation6 + $0x6] ss:$0 sm:$0xff] }
  0xde   :  { %2680 = vst [vmem:[#allocation30_spill] sm:$0xff] %v2209_v53  ;;  %v718_v49 = vsel %vm633_vm7, %v715_v13, %v717_v47 }
  0xdf   :  { %v701_v60 = vsel %vm633_vm7, %v699_v59, %v700_v1  ;;  %v2276_v1 = vld [vmem:[#allocation6 + $0x4] ss:$0 sm:$0xff] }
  0xe1   :  { %550 = vrot.lane.b32.xlu1 %v2075_v21, %s1767_s8  ;;  %552 = vrot.lane.b32.xlu0 %v2078_v40, %s1767_s8  ;;  %v707_v21 = vrot.slane %v1890_v38, 2  ;;  %v706_v40 = vsel %vm633_vm7, %v704_v4, %v705_v15  ;;  %v714_v38 = vrot.slane %v1888_v37, 2  ;;  %v2285_v4 = vld [vmem:[#allocation6 + $0x1] ss:$0 sm:$0xff] }
  0xe3   :  { %v708_v31 = vsel %vm633_vm7, %v705_v15, %v707_v21  ;;  %v716_v14 = vsel %vm633_vm7, %v714_v38, %v715_v13  ;;  %v2287_v15 = vld [vmem:[#allocation6 + $0x5] ss:$0 sm:$0xff] }
  0xe5   :  { %554 = vrot.lane.b32.xlu1 %v2081_v42, %s1767_s8  ;;  %719 = vrot.lane.b32.xlu0 %v701_v60, %s1766_s1  ;;  %v711_v42 = vsel %vm633_vm7, %v709_v56, %v710_v28  ;;  %v167_v56 = vmul.f32 %v2274_v63, %v1860_v26  ;;  %v168_v28 = vmul.f32 %v2285_v4, %v1858_v24 }
  0xe6   :  { %v169_v26 = vmul.f32 %v2285_v4, %v1870_v29  ;;  %v2315_v29 = vld [vmem:[#allocation6 + $0x3] ss:$0 sm:$0xff] }
  0xe7   :  { %v172_v52 = vmul.f32 %v2315_v29, %v1888_v37 }
  0xe9   :  { %721 = vrot.lane.b32.xlu1 %v703_v39, %s1766_s1  ;;  %723 = vrot.lane.b32.xlu0 %v706_v40, %s1766_s1 }
  0xed   :  { %725 = vrot.lane.b32.xlu1 %v708_v31, %s1766_s1  ;;  %727 = vrot.lane.b32.xlu0 %v711_v42, %s1766_s1 }
  0xf1   :  { %729 = vrot.lane.b32.xlu1 %v713_v16, %s1766_s1  ;;  %731 = vrot.lane.b32.xlu0 %v716_v14, %s1766_s1 }
  0xf5   :  { %733 = vrot.lane.b32.xlu1 %v718_v49, %s1766_s1  ;;  %788 = vrot.lane.b32.xlu0 %v701_v60, %s1767_s8  ;;  %v166_v60 = vmul.f32 %v2274_v63, %v1852_v22 }
  0xf9   :  { %790 = vrot.lane.b32.xlu1 %v703_v39, %s1767_s8  ;;  %792 = vrot.lane.b32.xlu0 %v706_v40, %s1767_s8 }
  0xfd   :  { %794 = vrot.lane.b32.xlu1 %v708_v31, %s1767_s8  ;;  %796 = vrot.lane.b32.xlu0 %v711_v42, %s1767_s8  ;;  %v2295_v42 = vld [vmem:[#allocation6 + $0x2] ss:$0 sm:$0xff] }
  0xfe   :  { %v170_v24 = vmul.f32 %v2295_v42, %v1872_v30 }
 0x101   :  { %798 = vrot.lane.b32.xlu1 %v713_v16, %s1767_s8  ;;  %800 = vrot.lane.b32.xlu0 %v716_v14, %s1767_s8 }
 0x105   :  { %802 = vrot.lane.b32.xlu1 %v718_v49, %s1767_s8  ;;  %978 = vrot.lane.b32.xlu0 %v2083_v5, %s1766_s1 }
 0x109   :  { %980 = vrot.lane.b32.xlu1 %v2047_v33, %s1766_s1  ;;  %982 = vrot.lane.b32.xlu0 %v2087_v7, %s1766_s1 }
 0x10d   :  { %984 = vrot.lane.b32.xlu1 %v2063_v62, %s1766_s1  ;;  %986 = vrot.lane.b32.xlu0 %v2089_v9, %s1766_s1 }
 0x111   :  { %988 = vrot.lane.b32.xlu1 %v2085_v6, %s1766_s1  ;;  %990 = vrot.lane.b32.xlu0 %v2120_v23, %s1766_s1 }
 0x115   :  { %992 = vrot.lane.b32.xlu1 %v2110_v20, %s1766_s1  ;;  %1046 = vrot.lane.b32.xlu0 %v2083_v5, %s1767_s8 }
 0x117   :  { %v220_v59 = vpop.permute.xlu0 %219 }
 0x118   :  { %v243_v19 = vmul.f32 %v2276_v1, %v220_v59  ;;  %v1206_v59 = vrot.slane %v2083_v5, 1 }
 0x119   :  { %1048 = vrot.lane.b32.xlu1 %v2047_v33, %s1767_s8  ;;  %1050 = vrot.lane.b32.xlu0 %v2087_v7, %s1767_s8 }
 0x11a   :  { %v251_v21 = vadd.f32 %v243_v19, %v166_v60  ;;  %v1207_v60 = vrot.slane %v2047_v33, 1  ;;  %v2317_v19 = vld [vmem:[#allocation6 + $0x7] ss:$0 sm:$0xff] }
 0x11b   :  { %v222_v39 = vpop.permute.xlu1 %221  ;;  %v224_v40 = vpop.permute.xlu0 %223 }
 0x11c   :  { %v244_v22 = vmul.f32 %v2276_v1, %v222_v39  ;;  %v245_v31 = vmul.f32 %v2287_v15, %v224_v40  ;;  %v171_v40 = vmul.f32 %v2295_v42, %v1884_v35  ;;  %v2332_v35 = vld [vmem:[#allocation6 + $0x8] ss:$0 sm:$0xff] }
 0x11d   :  { %1052 = vrot.lane.b32.xlu1 %v2063_v62, %s1767_s8  ;;  %1054 = vrot.lane.b32.xlu0 %v2089_v9, %s1767_s8 }
 0x11e   :  { %v252_v38 = vadd.f32 %v244_v22, %v167_v56  ;;  %v253_v13 = vadd.f32 %v245_v31, %v168_v28  ;;  %v1209_v28 = vrot.slane %v2049_v50, 1  ;;  %v1211_v31 = vrot.slane %v2087_v7, 1 }
 0x11f   :  { %v226_v16 = vpop.permute.xlu1 %225  ;;  %v228_v14 = vpop.permute.xlu0 %227 }
 0x120   :  { %v246_v47 = vmul.f32 %v2287_v15, %v226_v16  ;;  %v247_v49 = vmul.f32 %v2301_v34, %v228_v14  ;;  %v1212_v16 = vrot.slane %v2063_v62, 1  ;;  %v1210_v37 = vsel %vm381_vm6, %v1207_v60, %v1209_v28 }
 0x121   :  { %1056 = vrot.lane.b32.xlu1 %v2085_v6, %s1767_s8  ;;  %1058 = vrot.lane.b32.xlu0 %v2120_v23, %s1767_s8 }
 0x122   :  { %v254_v30 = vadd.f32 %v246_v47, %v169_v26  ;;  %v255_v39 = vadd.f32 %v247_v49, %v170_v24  ;;  %v1208_v26 = vsel %vm381_vm6, %v1206_v59, %v1207_v60  ;;  %v173_v49 = vmul.f32 %v2315_v29, %v1904_v44  ;;  %v2345_v44 = vld [vmem:[#allocation6 + $0x9] ss:$0 sm:$0xff] }
 0x123   :  { %v230_v56 = vpop.permute.xlu1 %229  ;;  %v232_v22 = vpop.permute.xlu0 %231  ;;  %v1214_v59 = vrot.slane %v2065_v0, 1 }
 0x124   :  { %v248_v14 = vmul.f32 %v2301_v34, %v230_v56  ;;  %v249_v53 = vmul.f32 %v2317_v19, %v232_v22  ;;  %v1213_v22 = vsel %vm381_vm6, %v1211_v31, %v1212_v16 }
 0x125   :  { %1060 = vrot.lane.b32.xlu1 %v2110_v20, %s1767_s8  ;;  %1226 = vrot.lane.b32.xlu0 %v1208_v26, %s1766_s1  ;;  %v1215_v31 = vsel %vm381_vm6, %v1212_v16, %v1214_v59 }
 0x126   :  { %v256_v24 = vadd.f32 %v248_v14, %v171_v40  ;;  %v257_v47 = vadd.f32 %v249_v53, %v172_v52  ;;  %v1217_v40 = vrot.slane %v2085_v6, 1  ;;  %v1219_v14 = vrot.slane %v2100_v54, 1 }
 0x127   :  { %v234_v56 = vpop.permute.xlu1 %233  ;;  %v289_v27 = vpop.permute.xlu0 %288 }
 0x128   :  { %v250_v46 = vmul.f32 %v2317_v19, %v234_v56  ;;  %v312_v36 = vmul.f32 %v2332_v35, %v289_v27  ;;  %v1221_v27 = vrot.slane %v2120_v23, 1  ;;  %v1222_v56 = vrot.slane %v2110_v20, 1 }
 0x129   :  { %1228 = vrot.lane.b32.xlu1 %v1210_v37, %s1766_s1  ;;  %1230 = vrot.lane.b32.xlu0 %v1213_v22, %s1766_s1  ;;  %v1218_v58 = vsel %vm381_vm6, %v1216_v41, %v1217_v40  ;;  %v1220_v59 = vsel %vm381_vm6, %v1217_v40, %v1219_v14 }
 0x12a   :  { %v258_v53 = vadd.f32 %v250_v46, %v173_v49  ;;  %v320_v52 = vadd.f32 %v312_v36, %v251_v21  ;;  %v2359_v36 = vld [vmem:[#allocation6 + $0xa] ss:$0 sm:$0xff] }
 0x12b   :  { %v291_v60 = vpop.permute.xlu1 %290  ;;  %v293_v28 = vpop.permute.xlu0 %292 }
 0x12c   :  { %v313_v48 = vmul.f32 %v2332_v35, %v291_v60  ;;  %v314_v32 = vmul.f32 %v2345_v44, %v293_v28  ;;  %v2355_v18 = vadd.f32 %v1921_v55, %v320_v52  ;;  %v1223_v60 = vsel %vm381_vm6, %v1221_v27, %v1222_v56 }
 0x12d   :  { %1232 = vrot.lane.b32.xlu1 %v1215_v31, %s1766_s1  ;;  %1234 = vrot.lane.b32.xlu0 %v1218_v58, %s1766_s1  ;;  %v1224_v28 = vrot.slane %v2118_v12, 1 }
 0x12e   :  { %v321_v46 = vadd.f32 %v313_v48, %v252_v38  ;;  %v322_v21 = vadd.f32 %v314_v32, %v253_v13  ;;  %v2374_v32 = vld [vmem:[#allocation6 + $0xb] ss:$0 sm:$0xff] }
 0x12f   :  { %v295_v16 = vpop.permute.xlu1 %294  ;;  %v297_v49 = vpop.permute.xlu0 %296  ;;  %v1225_v14 = vsel %vm381_vm6, %v1222_v56, %v1224_v28 }
 0x130   :  { %v315_v41 = vmul.f32 %v2345_v44, %v295_v16  ;;  %v316_v55 = vmul.f32 %v2359_v36, %v297_v49  ;;  %v2367_v52 = vadd.f32 %v1926_v57, %v321_v46  ;;  %v2370_v51 = vadd.f32 %v1937_v2, %v322_v21 }
 0x131   :  { %1236 = vrot.lane.b32.xlu1 %v1220_v59, %s1766_s1  ;;  %1238 = vrot.lane.b32.xlu0 %v1223_v60, %s1766_s1 }
 0x132   :  { %v323_v48 = vadd.f32 %v315_v41, %v254_v30  ;;  %v324_v38 = vadd.f32 %v316_v55, %v255_v39  ;;  %v2403_v55 = vld [vmem:[#allocation6 + $0x10] ss:$0 sm:$0xff] }
 0x133   :  { %v299_v13 = vpop.permute.xlu1 %298  ;;  %v301_v40 = vpop.permute.xlu0 %300  ;;  %2682 = vst [vmem:[#allocation32_spill] sm:$0xff] %v2403_v55 }
 0x134   :  { %v317_v27 = vmul.f32 %v2359_v36, %v299_v13  ;;  %v318_v57 = vmul.f32 %v2374_v32, %v301_v40  ;;  %v2380_v46 = vadd.f32 %v1940_v3, %v323_v48  ;;  %v2383_v2 = vadd.f32 %v1953_v10, %v324_v38  ;;  %v2414_v38 = vld [vmem:[#allocation6 + $0x11] ss:$0 sm:$0xff] }
 0x135   :  { %1240 = vrot.lane.b32.xlu1 %v1225_v14, %s1766_s1  ;;  %1294 = vrot.lane.b32.xlu0 %v1208_v26, %s1767_s8  ;;  %v1456_v48 = vrot.slane %v2063_v62, 2  ;;  %2683 = vst [vmem:[#allocation33_spill] sm:$0xff] %v2414_v38 }
 0x136   :  { %v325_v30 = vadd.f32 %v317_v27, %v256_v24  ;;  %v326_v39 = vadd.f32 %v318_v57, %v257_v47  ;;  %v1450_v47 = vrot.slane %v2083_v5, 2  ;;  %v1460_v57 = vrot.slane %v2089_v9, 2 }
 0x137   :  { %v303_v21 = vpop.permute.xlu1 %302  ;;  %v472_v16 = vpop.permute.xlu0 %471 }
 0x138   :  { %v319_v56 = vmul.f32 %v2374_v32, %v303_v21  ;;  %v2389_v49 = vadd.f32 %v1956_v11, %v325_v30  ;;  %v2392_v28 = vadd.f32 %v1969_v17, %v326_v39  ;;  %v1451_v17 = vrot.slane %v2047_v33, 2  ;;  %v2430_v21 = vld [vmem:[#allocation6 + $0x12] ss:$0 sm:$0xff] }
 0x139   :  { %1296 = vrot.lane.b32.xlu1 %v1210_v37, %s1767_s8  ;;  %1298 = vrot.lane.b32.xlu0 %v1213_v22, %s1767_s8  ;;  %v1461_v30 = vrot.slane %v2085_v6, 2 }
 0x13a   :  { %v327_v3 = vadd.f32 %v319_v56, %v258_v53  ;;  %v495_v53 = vmul.f32 %v2403_v55, %v472_v16  ;;  %v2440_v56 = vld [vmem:[#allocation6 + $0x15] ss:$0 sm:$0xff] }
 0x13b   :  { %v474_v10 = vpop.permute.xlu1 %473  ;;  %v476_v41 = vpop.permute.xlu0 %475 }
 0x13c   :  { %v2397_v26 = vadd.f32 %v1977_v25, %v327_v3  ;;  %v1453_v25 = vrot.slane %v2049_v50, 2  ;;  %v1458_v50 = vrot.slane %v2065_v0, 2  ;;  %v497_v39 = vmul.f32 %v2414_v38, %v476_v41 }
 0x13d   :  { %1300 = vrot.lane.b32.xlu1 %v1215_v31, %s1767_s8  ;;  %1302 = vrot.lane.b32.xlu0 %v1218_v58, %s1767_s8  ;;  %v2410_v58 = vsel %vm633_vm7, %v1450_v47, %v1451_v17  ;;  %v1455_v31 = vrot.slane %v2087_v7, 2  ;;  %v1465_v41 = vrot.slane %v2120_v23, 2  ;;  %v1466_v47 = vrot.slane %v2110_v20, 2 }
 0x13e   :  { %v2424_v27 = vsel %vm633_vm7, %v1451_v17, %v1453_v25  ;;  %v2443_v3 = vsel %vm633_vm7, %v1456_v48, %v1458_v50  ;;  %v2453_v50 = vld [vmem:[#allocation6 + $0x13] ss:$0 sm:$0xff] }
 0x13f   :  { %v478_v24 = vpop.permute.xlu1 %477  ;;  %v480_v11 = vpop.permute.xlu0 %479  ;;  %v2434_v0 = vsel %vm633_vm7, %v1455_v31, %v1456_v48  ;;  %v505_v48 = vadd.f32 %v497_v39, %v2370_v51 }
 0x140   :  { %v498_v25 = vmul.f32 %v2414_v38, %v478_v24  ;;  %v1468_v24 = vrot.slane %v2118_v12, 2 }
 0x141   :  { %1304 = vrot.lane.b32.xlu1 %v1220_v59, %s1767_s8  ;;  %1306 = vrot.lane.b32.xlu0 %v1223_v60, %s1767_s8  ;;  %v2419_v59 = vld [vmem:[#allocation6 + $0x14] ss:$0 sm:$0xff]  ;;  %v496_v60 = vmul.f32 %v2403_v55, %v474_v10  ;;  %v1463_v10 = vrot.slane %v2100_v54, 2  ;;  %v1462_v55 = vsel %vm633_vm7, %v1460_v57, %v1461_v30  ;;  %v1467_v57 = vsel %vm633_vm7, %v1465_v41, %v1466_v47 }
 0x142   :  { %2684 = vst [vmem:[#allocation34_spill] sm:$0xff] %v2419_v59  ;;  %v506_v39 = vadd.f32 %v498_v25, %v2380_v46  ;;  %v2478_v46 = vld [vmem:[#allocation6 + $0x17] ss:$0 sm:$0xff] }
 0x143   :  { %v482_v37 = vpop.permute.xlu1 %481  ;;  %v484_v22 = vpop.permute.xlu0 %483  ;;  %v504_v17 = vadd.f32 %v496_v60, %v2367_v52  ;;  %v2463_v52 = vld [vmem:[#allocation6 + $0x16] ss:$0 sm:$0xff]  ;;  %v1464_v60 = vsel %vm633_vm7, %v1461_v30, %v1463_v10 }
 0x145   :  { %1308 = vrot.lane.b32.xlu1 %v1225_v14, %s1767_s8  ;;  %1470 = vrot.lane.b32.xlu0 %v2410_v58, %s1766_s1  ;;  %v503_v14 = vadd.f32 %v495_v53, %v2355_v18  ;;  %v499_v53 = vmul.f32 %v2430_v21, %v480_v11 }
 0x147   :  { %v486_v13 = vpop.permute.xlu1 %485  ;;  %v541_v40 = vpop.permute.xlu0 %540 }
 0x148   :  { %v564_v16 = vmul.f32 %v2419_v59, %v541_v40  ;;  %v502_v41 = vmul.f32 %v2453_v50, %v486_v13 }
 0x149   :  { %1472 = vrot.lane.b32.xlu1 %v2424_v27, %s1766_s1  ;;  %1474 = vrot.lane.b32.xlu0 %v2434_v0, %s1766_s1 }
 0x14a   :  { %v572_v18 = vadd.f32 %v564_v16, %v503_v14 }
 0x14b   :  { %v543_v31 = vpop.permute.xlu1 %542  ;;  %v545_v40 = vpop.permute.xlu0 %544 }
 0x14c   :  { %v565_v54 = vmul.f32 %v2419_v59, %v543_v31  ;;  %v566_v14 = vmul.f32 %v2440_v56, %v545_v40  ;;  %v2458_v16 = vadd.f32 %v2018_v61, %v572_v18  ;;  %v507_v61 = vadd.f32 %v499_v53, %v2383_v2 }
 0x14d   :  { %1476 = vrot.lane.b32.xlu1 %v2443_v3, %s1766_s1  ;;  %1478 = vrot.lane.b32.xlu0 %v1462_v55, %s1766_s1  ;;  %v500_v18 = vmul.f32 %v2430_v21, %v482_v37  ;;  %v501_v31 = vmul.f32 %v2453_v50, %v484_v22  ;;  %v1469_v53 = vsel %vm633_vm7, %v1466_v47, %v1468_v24  ;;  %v2689_v24 = vld [vmem:[#allocation16_spill] sm:$0xff] }
 0x14e   :  { %v573_v11 = vadd.f32 %v565_v54, %v504_v17  ;;  %v574_v51 = vadd.f32 %v566_v14, %v505_v48  ;;  %v2685_v17 = vld [vmem:[#allocation12_spill] sm:$0xff]  ;;  %v2686_v54 = vld [vmem:[#allocation13_spill] sm:$0xff] }
 0x14f   :  { %v547_v40 = vpop.permute.xlu1 %546  ;;  %v549_v59 = vpop.permute.xlu0 %548  ;;  %v508_v22 = vadd.f32 %v500_v18, %v2389_v49  ;;  %v509_v10 = vadd.f32 %v501_v31, %v2392_v28  ;;  %v2690_v18 = vld [vmem:[#allocation17_spill] sm:$0xff] }
 0x150   :  { %v567_v38 = vmul.f32 %v2440_v56, %v547_v40  ;;  %v568_v12 = vmul.f32 %v2463_v52, %v549_v59  ;;  %v663_v48 = vadd.f32 %v2685_v17, %v573_v11  ;;  %v664_v30 = vadd.f32 %v2686_v54, %v574_v51  ;;  %v2687_v51 = vld [vmem:[#allocation14_spill] sm:$0xff]  ;;  %v2688_v17 = vld [vmem:[#allocation15_spill] sm:$0xff] }
 0x151   :  { %1480 = vrot.lane.b32.xlu1 %v1464_v60, %s1766_s1  ;;  %1482 = vrot.lane.b32.xlu0 %v1467_v57, %s1766_s1 }
 0x152   :  { %v575_v2 = vadd.f32 %v567_v38, %v506_v39  ;;  %v576_v37 = vadd.f32 %v568_v12, %v507_v61  ;;  %v510_v39 = vadd.f32 %v502_v41, %v2397_v26  ;;  %v2505_v41 = vld [vmem:[#allocation6 + $0x1c] ss:$0 sm:$0xff] }
 0x153   :  { %v551_v25 = vpop.permute.xlu1 %550  ;;  %v553_v59 = vpop.permute.xlu0 %552 }
 0x154   :  { %v569_v14 = vmul.f32 %v2463_v52, %v551_v25  ;;  %v570_v11 = vmul.f32 %v2478_v46, %v553_v59  ;;  %v665_v40 = vadd.f32 %v2687_v51, %v575_v2  ;;  %v666_v54 = vadd.f32 %v2688_v17, %v576_v37  ;;  %v2691_v37 = vld [vmem:[#allocation18_spill] sm:$0xff]  ;;  %v2510_v59 = vld [vmem:[#allocation6 + $0x1d] ss:$0 sm:$0xff]  ;;  %v2519_v17 = vld [vmem:[#allocation6 + $0x1e] ss:$0 sm:$0xff] }
 0x155   :  { %1484 = vrot.lane.b32.xlu1 %v1469_v53, %s1766_s1  ;;  %1538 = vrot.lane.b32.xlu0 %v2410_v58, %s1767_s8 }
 0x156   :  { %v577_v49 = vadd.f32 %v569_v14, %v508_v22  ;;  %v578_v28 = vadd.f32 %v570_v11, %v509_v10  ;;  %v2513_v14 = vld [vmem:[#allocation6 + $0x20] ss:$0 sm:$0xff] }
 0x157   :  { %v555_v38 = vpop.permute.xlu1 %554  ;;  %v720_v13 = vpop.permute.xlu0 %719 }
 0x158   :  { %v571_v47 = vmul.f32 %v2478_v46, %v555_v38  ;;  %v667_v61 = vadd.f32 %v2689_v24, %v577_v49  ;;  %v668_v31 = vadd.f32 %v2690_v18, %v578_v28  ;;  %v743_v25 = vmul.f32 %v2505_v41, %v720_v13  ;;  %v2521_v49 = vld [vmem:[#allocation6 + $0x21] ss:$0 sm:$0xff] }
 0x159   :  { %1540 = vrot.lane.b32.xlu1 %v2424_v27, %s1767_s8  ;;  %1542 = vrot.lane.b32.xlu0 %v2434_v0, %s1767_s8 }
 0x15a   :  { %v579_v12 = vadd.f32 %v571_v47, %v510_v39  ;;  %v751_v51 = vadd.f32 %v743_v25, %v2458_v16 }
 0x15b   :  { %v722_v58 = vpop.permute.xlu1 %721  ;;  %v724_v2 = vpop.permute.xlu0 %723 }
 0x15c   :  { %v2500_v22 = vadd.f32 %v2691_v37, %v579_v12  ;;  %v2528_v12 = vld [vmem:[#allocation6 + $0x1f] ss:$0 sm:$0xff] }
 0x15d   :  { %1544 = vrot.lane.b32.xlu1 %v2443_v3, %s1767_s8  ;;  %1546 = vrot.lane.b32.xlu0 %v1462_v55, %s1767_s8  ;;  %v744_v55 = vmul.f32 %v2505_v41, %v722_v58  ;;  %v2530_v58 = vld [vmem:[#allocation6 + $0x22] ss:$0 sm:$0xff] }
 0x15f   :  { %v726_v26 = vpop.permute.xlu1 %725  ;;  %v728_v10 = vpop.permute.xlu0 %727  ;;  %v752_v38 = vadd.f32 %v744_v55, %v663_v48 }
 0x160   :  { %v747_v24 = vmul.f32 %v2519_v17, %v728_v10 }
 0x161   :  { %1548 = vrot.lane.b32.xlu1 %v1464_v60, %s1767_s8  ;;  %1550 = vrot.lane.b32.xlu0 %v1467_v57, %s1767_s8  ;;  %v745_v60 = vmul.f32 %v2510_v59, %v724_v2 }
 0x163   :  { %v730_v27 = vpop.permute.xlu1 %729  ;;  %v732_v0 = vpop.permute.xlu0 %731  ;;  %v753_v47 = vadd.f32 %v745_v60, %v664_v30  ;;  %v755_v30 = vadd.f32 %v747_v24, %v666_v54  ;;  %v2538_v60 = vld [vmem:[#allocation6 + $0x23] ss:$0 sm:$0xff] }
 0x164   :  { %v749_v10 = vmul.f32 %v2528_v12, %v732_v0 }
 0x165   :  { %1552 = vrot.lane.b32.xlu1 %v1469_v53, %s1767_s8  ;;  %v746_v53 = vmul.f32 %v2510_v59, %v726_v26  ;;  %v748_v26 = vmul.f32 %v2519_v17, %v730_v27 }
 0x167   :  { %v734_v3 = vpop.permute.xlu1 %733  ;;  %v789_v11 = vpop.permute.xlu0 %788  ;;  %v754_v48 = vadd.f32 %v746_v53, %v665_v40  ;;  %v756_v40 = vadd.f32 %v748_v26, %v667_v61  ;;  %v757_v53 = vadd.f32 %v749_v10, %v668_v31  ;;  %v926_v31 = vmul.f32 %v2274_v63, %v2083_v5 }
 0x168   :  { %v812_v57 = vmul.f32 %v2513_v14, %v789_v11  ;;  %v750_v54 = vmul.f32 %v2528_v12, %v734_v3 }
 0x16a   :  { %v820_v28 = vadd.f32 %v812_v57, %v751_v51 }
 0x16b   :  { %v791_v13 = vpop.permute.xlu1 %790  ;;  %v793_v39 = vpop.permute.xlu0 %792 }
 0x16c   :  { %829 = vst.msk [vmem:[#allocation8] sm:$0xff] %vm828_vm8, %v820_v28  ;;  %v813_v16 = vmul.f32 %v2513_v14, %v791_v13  ;;  %v814_v18 = vmul.f32 %v2521_v49, %v793_v39 }
 0x16e   :  { %v821_v2 = vadd.f32 %v813_v16, %v752_v38  ;;  %v822_v37 = vadd.f32 %v814_v18, %v753_v47  ;;  %v758_v18 = vadd.f32 %v750_v54, %v2500_v22  ;;  %v927_v22 = vmul.f32 %v2274_v63, %v2047_v33 }
 0x16f   :  { %v795_v25 = vpop.permute.xlu1 %794  ;;  %v797_v55 = vpop.permute.xlu0 %796  ;;  %v932_v54 = vmul.f32 %v2315_v29, %v2120_v23 }
 0x170   :  { %830 = vst.msk [vmem:[#allocation8 + $0x8] sm:$0xff] %vm828_vm8, %v821_v2  ;;  %831 = vst.msk [vmem:[#allocation8 + $0x10] sm:$0xff] %vm828_vm8, %v822_v37  ;;  %v815_v11 = vmul.f32 %v2521_v49, %v795_v25  ;;  %v816_v51 = vmul.f32 %v2530_v58, %v797_v55  ;;  %v928_v55 = vmul.f32 %v2285_v4, %v2087_v7 }
 0x172   :  { %v823_v57 = vadd.f32 %v815_v11, %v754_v48  ;;  %v824_v28 = vadd.f32 %v816_v51, %v755_v30 }
 0x173   :  { %v799_v38 = vpop.permute.xlu1 %798  ;;  %v801_v27 = vpop.permute.xlu0 %800 }
 0x174   :  { %832 = vst.msk [vmem:[#allocation8 + $0x18] sm:$0xff] %vm828_vm8, %v823_v57  ;;  %833 = vst.msk [vmem:[#allocation8 + $0x20] sm:$0xff] %vm828_vm8, %v824_v28  ;;  %v817_v0 = vmul.f32 %v2530_v58, %v799_v38  ;;  %v818_v13 = vmul.f32 %v2538_v60, %v801_v27  ;;  %v929_v57 = vmul.f32 %v2285_v4, %v2063_v62 }
 0x175   :  { %v931_v27 = vmul.f32 %v2295_v42, %v2085_v6 }
 0x176   :  { %v825_v39 = vadd.f32 %v817_v0, %v756_v40  ;;  %v826_v47 = vadd.f32 %v818_v13, %v757_v53  ;;  %v930_v40 = vmul.f32 %v2295_v42, %v2089_v9  ;;  %v933_v13 = vmul.f32 %v2315_v29, %v2110_v20 }
 0x177   :  { %v803_v24 = vpop.permute.xlu1 %802  ;;  %v979_v16 = vpop.permute.xlu0 %978 }
 0x178   :  { %834 = vst.msk [vmem:[#allocation8 + $0x28] sm:$0xff] %vm828_vm8, %v825_v39  ;;  %835 = vst.msk [vmem:[#allocation8 + $0x30] sm:$0xff] %vm828_vm8, %v826_v47  ;;  %v819_v61 = vmul.f32 %v2538_v60, %v803_v24  ;;  %v1002_v3 = vmul.f32 %v2276_v1, %v979_v16 }
 0x17a   :  { %v827_v2 = vadd.f32 %v819_v61, %v758_v18  ;;  %v1010_v37 = vadd.f32 %v1002_v3, %v926_v31 }
 0x17b   :  { %v981_v48 = vpop.permute.xlu1 %980  ;;  %v983_v26 = vpop.permute.xlu0 %982 }
 0x17c   :  { %836 = vst.msk [vmem:[#allocation8 + $0x38] sm:$0xff] %vm828_vm8, %v827_v2  ;;  %v1003_v25 = vmul.f32 %v2276_v1, %v981_v48  ;;  %v1004_v30 = vmul.f32 %v2287_v15, %v983_v26 }
 0x17e   :  { %v1011_v10 = vadd.f32 %v1003_v25, %v927_v22  ;;  %v1012_v5 = vadd.f32 %v1004_v30, %v928_v55  ;;  %v2692_v55 = vld [vmem:[#allocation19_spill] sm:$0xff] }
 0x17f   :  { %v985_v11 = vpop.permute.xlu1 %984  ;;  %v987_v51 = vpop.permute.xlu0 %986 }
 0x180   :  { %v1005_v28 = vmul.f32 %v2287_v15, %v985_v11  ;;  %v1006_v33 = vmul.f32 %v2301_v34, %v987_v51 }
 0x182   :  { %v1013_v63 = vadd.f32 %v1005_v28, %v929_v57  ;;  %v1014_v1 = vadd.f32 %v1006_v33, %v930_v40  ;;  %v2694_v28 = vld [vmem:[#allocation21_spill] sm:$0xff]  ;;  %v2695_v40 = vld [vmem:[#allocation22_spill] sm:$0xff] }
 0x183   :  { %v989_v38 = vpop.permute.xlu1 %988  ;;  %v991_v7 = vpop.permute.xlu0 %990 }
 0x184   :  { %v1007_v53 = vmul.f32 %v2301_v34, %v989_v38  ;;  %v1008_v62 = vmul.f32 %v2317_v19, %v991_v7 }
 0x186   :  { %v1015_v4 = vadd.f32 %v1007_v53, %v931_v27  ;;  %v1016_v15 = vadd.f32 %v1008_v62, %v932_v54 }
 0x187   :  { %v993_v0 = vpop.permute.xlu1 %992  ;;  %v1047_v9 = vpop.permute.xlu0 %1046 }
 0x188   :  { %v1009_v39 = vmul.f32 %v2317_v19, %v993_v0  ;;  %v1070_v47 = vmul.f32 %v2332_v35, %v1047_v9  ;;  %v2697_v0 = vld [vmem:[#allocation32_spill] sm:$0xff] }
 0x18a   :  { %v1017_v24 = vadd.f32 %v1009_v39, %v933_v13  ;;  %v1078_v6 = vadd.f32 %v1070_v47, %v1010_v37  ;;  %v2698_v39 = vld [vmem:[#allocation33_spill] sm:$0xff] }
 0x18b   :  { %v1049_v42 = vpop.permute.xlu1 %1048  ;;  %v1051_v34 = vpop.permute.xlu0 %1050 }
 0x18c   :  { %v1071_v16 = vmul.f32 %v2332_v35, %v1049_v42  ;;  %v1072_v23 = vmul.f32 %v2345_v44, %v1051_v34  ;;  %v1166_v18 = vadd.f32 %v2123_v43, %v1078_v6  ;;  %v2699_v6 = vld [vmem:[#allocation34_spill] sm:$0xff] }
 0x18e   :  { %v1079_v61 = vadd.f32 %v1071_v16, %v1011_v10  ;;  %v1080_v31 = vadd.f32 %v1072_v23, %v1012_v5  ;;  %v2693_v10 = vld [vmem:[#allocation20_spill] sm:$0xff] }
 0x18f   :  { %v1053_v3 = vpop.permute.xlu1 %1052  ;;  %v1055_v2 = vpop.permute.xlu0 %1054 }
 0x190   :  { %v1073_v20 = vmul.f32 %v2345_v44, %v1053_v3  ;;  %v1074_v29 = vmul.f32 %v2359_v36, %v1055_v2  ;;  %v1167_v19 = vadd.f32 %v2126_v45, %v1079_v61  ;;  %v1168_v37 = vadd.f32 %v2131_v8, %v1080_v31 }
 0x192   :  { %v1081_v48 = vadd.f32 %v1073_v20, %v1013_v63  ;;  %v1082_v26 = vadd.f32 %v1074_v29, %v1014_v1  ;;  %v2700_v29 = vld [vmem:[#allocation24_spill] sm:$0xff] }
 0x193   :  { %v1057_v22 = vpop.permute.xlu1 %1056  ;;  %v1059_v35 = vpop.permute.xlu0 %1058 }
 0x194   :  { %v1075_v25 = vmul.f32 %v2359_v36, %v1057_v22  ;;  %v1076_v43 = vmul.f32 %v2374_v32, %v1059_v35  ;;  %v1169_v30 = vadd.f32 %v2692_v55, %v1081_v48  ;;  %v1170_v5 = vadd.f32 %v2693_v10, %v1082_v26  ;;  %v2696_v36 = vld [vmem:[#allocation23_spill] sm:$0xff] }
 0x196   :  { %v1083_v11 = vadd.f32 %v1075_v25, %v1015_v4  ;;  %v1084_v44 = vadd.f32 %v1076_v43, %v1016_v15 }
 0x197   :  { %v1061_v51 = vpop.permute.xlu1 %1060  ;;  %v1227_v57 = vpop.permute.xlu0 %1226 }
 0x198   :  { %v1077_v45 = vmul.f32 %v2374_v32, %v1061_v51  ;;  %v1171_v8 = vadd.f32 %v2694_v28, %v1083_v11  ;;  %v1172_v33 = vadd.f32 %v2695_v40, %v1084_v44  ;;  %v1250_v4 = vmul.f32 %v2697_v0, %v1227_v57  ;;  %v2701_v11 = vld [vmem:[#allocation25_spill] sm:$0xff]  ;;  %v2702_v51 = vld [vmem:[#allocation26_spill] sm:$0xff] }
 0x19a   :  { %v1085_v63 = vadd.f32 %v1077_v45, %v1017_v24  ;;  %v1258_v32 = vadd.f32 %v1250_v4, %v1166_v18 }
 0x19b   :  { %v1229_v1 = vpop.permute.xlu1 %1228  ;;  %v1231_v38 = vpop.permute.xlu0 %1230 }
 0x19c   :  { %v1173_v7 = vadd.f32 %v2696_v36, %v1085_v63  ;;  %v1251_v15 = vmul.f32 %v2697_v0, %v1229_v1  ;;  %v1252_v47 = vmul.f32 %v2698_v39, %v1231_v38  ;;  %v2703_v36 = vld [vmem:[#allocation27_spill] sm:$0xff] }
 0x19e   :  { %v1259_v34 = vadd.f32 %v1251_v15, %v1167_v19  ;;  %v1260_v3 = vadd.f32 %v1252_v47, %v1168_v37  ;;  %v2707_v47 = vld [vmem:[#allocation31_spill] sm:$0xff] }
 0x19f   :  { %v1233_v27 = vpop.permute.xlu1 %1232  ;;  %v1235_v53 = vpop.permute.xlu0 %1234 }
 0x1a0   :  { %v1253_v16 = vmul.f32 %v2698_v39, %v1233_v27  ;;  %v1254_v23 = vmul.f32 %v2430_v21, %v1235_v53  ;;  %v2704_v27 = vld [vmem:[#allocation28_spill] sm:$0xff] }
 0x1a2   :  { %v1261_v22 = vadd.f32 %v1253_v16, %v1169_v30  ;;  %v1262_v35 = vadd.f32 %v1254_v23, %v1170_v5 }
 0x1a3   :  { %v1237_v54 = vpop.permute.xlu1 %1236  ;;  %v1239_v62 = vpop.permute.xlu0 %1238 }
 0x1a4   :  { %v1255_v25 = vmul.f32 %v2430_v21, %v1237_v54  ;;  %v1256_v19 = vmul.f32 %v2453_v50, %v1239_v62 }
 0x1a6   :  { %v1263_v40 = vadd.f32 %v1255_v25, %v1171_v8  ;;  %v1264_v63 = vadd.f32 %v1256_v19, %v1172_v33  ;;  %v2705_v33 = vld [vmem:[#allocation29_spill] sm:$0xff] }
 0x1a7   :  { %v1241_v9 = vpop.permute.xlu1 %1240  ;;  %v1295_v13 = vpop.permute.xlu0 %1294 }
 0x1a8   :  { %v1318_v42 = vmul.f32 %v2699_v6, %v1295_v13  ;;  %v1257_v30 = vmul.f32 %v2453_v50, %v1241_v9  ;;  %v2706_v50 = vld [vmem:[#allocation30_spill] sm:$0xff] }
 0x1aa   :  { %v1326_v24 = vadd.f32 %v1318_v42, %v1258_v32  ;;  %v1265_v15 = vadd.f32 %v1257_v30, %v1173_v7 }
 0x1ab   :  { %v1297_v61 = vpop.permute.xlu1 %1296  ;;  %v1299_v31 = vpop.permute.xlu0 %1298 }
 0x1ac   :  { %v1319_v2 = vmul.f32 %v2699_v6, %v1297_v61  ;;  %v1320_v20 = vmul.f32 %v2440_v56, %v1299_v31  ;;  %v1414_v48 = vadd.f32 %v2700_v29, %v1326_v24 }
 0x1ae   :  { %v1327_v18 = vadd.f32 %v1319_v2, %v1259_v34  ;;  %v1328_v26 = vadd.f32 %v1320_v20, %v1260_v3 }
 0x1af   :  { %v1301_v43 = vpop.permute.xlu1 %1300  ;;  %v1303_v55 = vpop.permute.xlu0 %1302 }
 0x1b0   :  { %v1321_v10 = vmul.f32 %v2440_v56, %v1301_v43  ;;  %v1322_v37 = vmul.f32 %v2463_v52, %v1303_v55  ;;  %v1415_v44 = vadd.f32 %v2701_v11, %v1327_v18  ;;  %v1416_v57 = vadd.f32 %v2702_v51, %v1328_v26 }
 0x1b2   :  { %v1329_v45 = vadd.f32 %v1321_v10, %v1261_v22  ;;  %v1330_v28 = vadd.f32 %v1322_v37, %v1262_v35 }
 0x1b3   :  { %v1305_v5 = vpop.permute.xlu1 %1304  ;;  %v1307_v21 = vpop.permute.xlu0 %1306 }
 0x1b4   :  { %v1323_v1 = vmul.f32 %v2463_v52, %v1305_v5  ;;  %v1324_v38 = vmul.f32 %v2478_v46, %v1307_v21  ;;  %v1417_v56 = vadd.f32 %v2703_v36, %v1329_v45  ;;  %v1418_v53 = vadd.f32 %v2704_v27, %v1330_v28 }
 0x1b6   :  { %v1331_v54 = vadd.f32 %v1323_v1, %v1263_v40  ;;  %v1332_v62 = vadd.f32 %v1324_v38, %v1264_v63 }
 0x1b7   :  { %v1309_v0 = vpop.permute.xlu1 %1308  ;;  %v1471_v4 = vpop.permute.xlu0 %1470 }
 0x1b8   :  { %v1325_v8 = vmul.f32 %v2478_v46, %v1309_v0  ;;  %v1419_v13 = vadd.f32 %v2705_v33, %v1331_v54  ;;  %v1420_v9 = vadd.f32 %v2706_v50, %v1332_v62  ;;  %v1494_v23 = vmul.f32 %v2505_v41, %v1471_v4 }
 0x1ba   :  { %v1333_v32 = vadd.f32 %v1325_v8, %v1265_v15  ;;  %v1502_v46 = vadd.f32 %v1494_v23, %v1414_v48 }
 0x1bb   :  { %v1473_v39 = vpop.permute.xlu1 %1472  ;;  %v1475_v52 = vpop.permute.xlu0 %1474 }
 0x1bc   :  { %v1421_v6 = vadd.f32 %v2707_v47, %v1333_v32  ;;  %v1495_v61 = vmul.f32 %v2505_v41, %v1473_v39  ;;  %v1496_v3 = vmul.f32 %v2510_v59, %v1475_v52 }
 0x1be   :  { %v1503_v29 = vadd.f32 %v1495_v61, %v1415_v44  ;;  %v1504_v35 = vadd.f32 %v1496_v3, %v1416_v57 }
 0x1bf   :  { %v1477_v42 = vpop.permute.xlu1 %1476  ;;  %v1479_v24 = vpop.permute.xlu0 %1478 }
 0x1c0   :  { %v1497_v18 = vmul.f32 %v2510_v59, %v1477_v42  ;;  %v1498_v25 = vmul.f32 %v2519_v17, %v1479_v24 }
 0x1c2   :  { %v1505_v55 = vadd.f32 %v1497_v18, %v1417_v56  ;;  %v1506_v44 = vadd.f32 %v1498_v25, %v1418_v53 }
 0x1c3   :  { %v1481_v34 = vpop.permute.xlu1 %1480  ;;  %v1483_v16 = vpop.permute.xlu0 %1482 }
 0x1c4   :  { %v1499_v10 = vmul.f32 %v2519_v17, %v1481_v34  ;;  %v1500_v59 = vmul.f32 %v2528_v12, %v1483_v16 }
 0x1c6   :  { %v1507_v28 = vadd.f32 %v1499_v10, %v1419_v13  ;;  %v1508_v30 = vadd.f32 %v1500_v59, %v1420_v9 }
 0x1c7   :  { %v1485_v7 = vpop.permute.xlu1 %1484  ;;  %v1539_v31 = vpop.permute.xlu0 %1538 }
 0x1c8   :  { %v1562_v2 = vmul.f32 %v2513_v14, %v1539_v31  ;;  %v1501_v17 = vmul.f32 %v2528_v12, %v1485_v7 }
 0x1ca   :  { %v1570_v20 = vadd.f32 %v1562_v2, %v1502_v46  ;;  %v1509_v36 = vadd.f32 %v1501_v17, %v1421_v6 }
 0x1cb   :  { %v1541_v26 = vpop.permute.xlu1 %1540  ;;  %v1543_v22 = vpop.permute.xlu0 %1542 }
 0x1cc   :  { %1579 = vst.msk [vmem:[#allocation8 + $0x40] sm:$0xff] %vm828_vm8, %v1570_v20  ;;  %v1563_v41 = vmul.f32 %v2513_v14, %v1541_v26  ;;  %v1564_v19 = vmul.f32 %v2521_v49, %v1543_v22 }
 0x1ce   :  { %v1571_v48 = vadd.f32 %v1563_v41, %v1503_v29  ;;  %v1572_v43 = vadd.f32 %v1564_v19, %v1504_v35 }
 0x1cf   :  { %v1545_v37 = vpop.permute.xlu1 %1544  ;;  %v1547_v11 = vpop.permute.xlu0 %1546 }
 0x1d0   :  { %1580 = vst.msk [vmem:[#allocation8 + $0x48] sm:$0xff] %vm828_vm8, %v1571_v48  ;;  %1581 = vst.msk [vmem:[#allocation8 + $0x50] sm:$0xff] %vm828_vm8, %v1572_v43  ;;  %v1565_v51 = vmul.f32 %v2521_v49, %v1545_v37  ;;  %v1566_v14 = vmul.f32 %v2530_v58, %v1547_v11 }
 0x1d2   :  { %v1573_v57 = vadd.f32 %v1565_v51, %v1505_v55  ;;  %v1574_v45 = vadd.f32 %v1566_v14, %v1506_v44 }
 0x1d3   :  { %v1549_v40 = vpop.permute.xlu1 %1548  ;;  %v1551_v63 = vpop.permute.xlu0 %1550 }
 0x1d4   :  { %1582 = vst.msk [vmem:[#allocation8 + $0x58] sm:$0xff] %vm828_vm8, %v1573_v57  ;;  %1583 = vst.msk [vmem:[#allocation8 + $0x60] sm:$0xff] %vm828_vm8, %v1574_v45  ;;  %v1567_v5 = vmul.f32 %v2530_v58, %v1549_v40  ;;  %v1568_v21 = vmul.f32 %v2538_v60, %v1551_v63 }
 0x1d6   :  { %v1575_v1 = vadd.f32 %v1567_v5, %v1507_v28  ;;  %v1576_v49 = vadd.f32 %v1568_v21, %v1508_v30 }
 0x1d7   :  { %v1553_v38 = vpop.permute.xlu1 %1552 }
 0x1d8   :  { %1584 = vst.msk [vmem:[#allocation8 + $0x68] sm:$0xff] %vm828_vm8, %v1575_v1  ;;  %1585 = vst.msk [vmem:[#allocation8 + $0x70] sm:$0xff] %vm828_vm8, %v1576_v49  ;;  %v1569_v12 = vmul.f32 %v2538_v60, %v1553_v38 }
 0x1da   :  { %v1577_v56 = vadd.f32 %v1569_v12, %v1509_v36 }
 0x1dc   :  { %1586 = vst.msk [vmem:[#allocation8 + $0x78] sm:$0xff] %vm828_vm8, %v1577_v56 }
 0x1dd   :  { %1742 = shalt.err (!%p1739_p6)
}
 0x1de   :  { %s1743_s14 = scalar_lea.hbm %s2655_s2, 2048 }
 0x1df   :  { %p1744_p7 = scmp.ne.s32.totalorder %s2655_s2, %s1743_s14  ;;  %p1747_p8 = scmp.lt.u32.totalorder %s1743_s14, %s2655_s2 }
 0x1e1   :  { %p1749_p9 = pnand %p1747_p8, %p1744_p7 }
 0x1e3   :  { %1752 = shalt.err (!%p1749_p9)
}
 0x1e4   :  { %1598 = dma.vmem_to_hbm [thread:$0]  %s1593_s10, 2048, %s2655_s2, [#allocation5], %s1760_s19, %s1760_s19, %s1761_s20  }
 0x1e5   :  { %1757 = dma.done.wait [#allocation5], 2048  }
 0x1e6   :  { %1758 = vsyncadd [#allocation5], 4294965248 }
 0x1e7   :  { %1602 = vsyncpa [#allocation4], 1 }
 0x1e8   :  { %1603 = vsyncpa [#allocation7], 1 }
 0x1e9   :  { %1604 = vsyncpa [#allocation5], 1 }

</bundles_post_ra>
